<compile_context>
chip_gen: v7x
topology: tpu7x:2x2x1
jax: 0.10.0
libtpu: 0.0.40
codegen_flags: <defaults>
</compile_context>

<pallas_src>
import jax
import jax.numpy as jnp
from jax import lax
from jax.experimental import pallas as pl
from jax.experimental.pallas import tpu as pltpu

BN_EPS = 1e-5
_VMEM_LIMIT = 32 * 1024 * 1024  # safe on v5e/v6e (128 MiB phys) and v7x (64 MiB phys)


# --------------------------------------------------------------------------- #
# Pass 1: 3x3 conv (in-kernel im2col) + per-tile sum / sum-of-squares
# --------------------------------------------------------------------------- #
def conv_stats_kernel(xp_ref, w_ref, conv_ref, stats_ref):
    # xp_ref   : (1, H+2, W+2, Cin)  whole padded image for this batch (resident)
    # w_ref    : (3, 3, Cin, Cpad)   resident, channel-padded weights
    # conv_ref : (1, TH, W, Cpad)    conv output tile
    # stats_ref: (1, 1, 2, Cpad)     [sum, sum_of_squares] for this tile
    hb = pl.program_id(1)
    _, TH, W, Cpad = conv_ref.shape
    Cin = xp_ref.shape[3]

    h0 = pl.multiple_of(hb * TH, TH)          # first (padded) row of this tile

    acc = jnp.zeros((TH * W, Cpad), jnp.float32)
    for kh in range(3):
        for kw in range(3):
            patch = xp_ref[0, pl.ds(h0 + kh, TH), kw:kw + W, :]   # (TH, W, Cin)
            patch = patch.reshape(TH * W, Cin)
            w_tap = w_ref[kh, kw]                                 # (Cin, Cpad)
            acc = acc + jnp.dot(patch, w_tap,
                                preferred_element_type=jnp.float32)

    conv_ref[...] = acc.reshape(1, TH, W, Cpad)

    # One-pass statistics (E[x], E[x^2]); reduced globally in the wrapper.
    ssum = jnp.sum(acc, axis=0, keepdims=True)                    # (1, Cpad)
    ssq = jnp.sum(acc * acc, axis=0, keepdims=True)               # (1, Cpad)
    stats_ref[:, :, 0:1, :] = ssum[None, None]
    stats_ref[:, :, 1:2, :] = ssq[None, None]


# --------------------------------------------------------------------------- #
# Pass 2: normalize + affine + ReLU (lane-dense, fully parallel grid)
# --------------------------------------------------------------------------- #
def bn_relu_kernel(conv_ref, scale_ref, shift_ref, out_ref):
    # conv_ref/out_ref: (1, TH, W, Cpad)   scale/shift: (1, Cpad)
    scale = scale_ref[...].reshape(1, 1, 1, -1)
    shift = shift_ref[...].reshape(1, 1, 1, -1)
    y = conv_ref[...] * scale + shift
    out_ref[...] = jnp.maximum(y, 0.0)


# --------------------------------------------------------------------------- #
# Wrapper
# --------------------------------------------------------------------------- #
def simple_conv_forward(x_nchw, weight_oihw, gamma, beta,
                        *, max_tile_rows=512, use_bf16_matmul=False):
    """x_nchw: (N, Cin, H, W) f32; weight_oihw: (Cout, Cin, 3, 3) f32."""
    N, Cin, H, W = x_nchw.shape
    Cout = weight_oihw.shape[0]
    Cpad = ((Cout + 127) // 128) * 128        # lane-dense output channels

    # Tile height: largest divisor of H with TH*W <= max_tile_rows.
    TH = 1
    for d in range(1, H + 1):
        if H % d == 0 and d * W <= max_tile_rows:
            TH = d
    HB = H // TH

    compute_dtype = jnp.bfloat16 if use_bf16_matmul else jnp.float32

    # ---- glue: NCHW -> NHWC (PyTorch contract), spatial pad ----
    x = jnp.transpose(x_nchw, (0, 2, 3, 1)).astype(compute_dtype)     # (N,H,W,Cin)
    xp = jnp.pad(x, ((0, 0), (1, 1), (1, 1), (0, 0)))                 # (N,H+2,W+2,Cin)

    # weight (Cout, Cin, 3, 3) -> (3, 3, Cin, Cpad), zero-padded channels
    w = jnp.transpose(weight_oihw, (2, 3, 1, 0))                      # (3,3,Cin,Cout)
    w = jnp.pad(w, ((0, 0), (0, 0), (0, 0), (0, Cpad - Cout))).astype(compute_dtype)

    itemsize = jnp.dtype(compute_dtype).itemsize
    conv_flops = 2 * N * H * W * 9 * Cin * Cpad
    conv_bytes = (xp.size * itemsize + w.size * itemsize
                  + N * H * W * Cpad * 4 + N * HB * 2 * Cpad * 4)

    conv_out, stats = pl.pallas_call(
        conv_stats_kernel,
        out_shape=(
            jax.ShapeDtypeStruct((N, H, W, Cpad), jnp.float32),
            jax.ShapeDtypeStruct((N, HB, 2, Cpad), jnp.float32),
        ),
        grid=(N, HB),
        in_specs=[
            pl.BlockSpec((1, H + 2, W + 2, Cin), lambda n, hb: (n, 0, 0, 0)),
            pl.BlockSpec((3, 3, Cin, Cpad), lambda n, hb: (0, 0, 0, 0)),
        ],
        out_specs=(
            pl.BlockSpec((1, TH, W, Cpad), lambda n, hb: (n, hb, 0, 0)),
            pl.BlockSpec((1, 1, 2, Cpad), lambda n, hb: (n, hb, 0, 0)),
        ),
        compiler_params=pltpu.CompilerParams(
            dimension_semantics=("parallel", "parallel"),
            vmem_limit_bytes=_VMEM_LIMIT),
        cost_estimate=pl.CostEstimate(flops=conv_flops, transcendentals=0,
                                      bytes_accessed=conv_bytes),
    )(xp, w)

    # ---- tiny glue: reduce partial stats -> per-channel scale/shift ----
    count = jnp.float32(N * H * W)
    sums = jnp.sum(stats[:, :, 0, :], axis=(0, 1))                    # (Cpad,)
    sumsq = jnp.sum(stats[:, :, 1, :], axis=(0, 1))                   # (Cpad,)
    mean = sums / count
    var = jnp.maximum(sumsq / count - mean * mean, 0.0)               # biased (training BN)
    gamma_p = jnp.pad(gamma.astype(jnp.float32), (0, Cpad - Cout))
    beta_p = jnp.pad(beta.astype(jnp.float32), (0, Cpad - Cout))
    scale = gamma_p * lax.rsqrt(var + BN_EPS)
    shift = beta_p - mean * scale

    norm_bytes = 2 * N * H * W * Cpad * 4 + 2 * Cpad * 4
    out_nhwc = pl.pallas_call(
        bn_relu_kernel,
        out_shape=jax.ShapeDtypeStruct((N, H, W, Cpad), jnp.float32),
        grid=(N, HB),
        in_specs=[
            pl.BlockSpec((1, TH, W, Cpad), lambda n, hb: (n, hb, 0, 0)),
            pl.BlockSpec((1, Cpad), lambda n, hb: (0, 0)),
            pl.BlockSpec((1, Cpad), lambda n, hb: (0, 0)),
        ],
        out_specs=pl.BlockSpec((1, TH, W, Cpad), lambda n, hb: (n, hb, 0, 0)),
        compiler_params=pltpu.CompilerParams(
            dimension_semantics=("parallel", "parallel"),
            vmem_limit_bytes=_VMEM_LIMIT),
        cost_estimate=pl.CostEstimate(flops=3 * N * H * W * Cpad, transcendentals=0,
                                      bytes_accessed=norm_bytes),
    )(conv_out, scale.reshape(1, Cpad), shift.reshape(1, Cpad))

    # ---- glue: drop channel padding, NHWC -> NCHW (PyTorch output layout) ----
    # TODO(synk): a channels-last consumer could skip this transpose entirely.
    return jnp.transpose(out_nhwc[..., :Cout], (0, 3, 1, 2))


# --------------------------------------------------------------------------- #
# Pure-JAX reference mirroring the PyTorch module (training-mode BN)
# --------------------------------------------------------------------------- #
def reference_forward(x_nchw, weight_oihw, gamma, beta):
    conv = lax.conv_general_dilated(
        x_nchw, weight_oihw, window_strides=(1, 1),
        padding=((1, 1), (1, 1)),
        dimension_numbers=("NCHW", "OIHW", "NCHW"))
    mean = jnp.mean(conv, axis=(0, 2, 3), keepdims=True)
    var = jnp.mean(jnp.square(conv - mean), axis=(0, 2, 3), keepdims=True)
    y = (conv - mean) * lax.rsqrt(var + BN_EPS)
    y = y * gamma.reshape(1, -1, 1, 1) + beta.reshape(1, -1, 1, 1)
    return jnp.maximum(y, 0.0)


if __name__ == "__main__":
    N, Cin, Cout, H, W = 2, 4, 8, 16, 16

    key = jax.random.PRNGKey(0)
    kx, kw = jax.random.split(key)
    x = jax.random.normal(kx, (N, Cin, H, W), dtype=jnp.float32)
    # Deterministic Conv2d weight init (kaiming-uniform-style bound).
    fan_in = Cin * 3 * 3
    bound = 1.0 / (fan_in ** 0.5)
    weight = jax.random.uniform(kw, (Cout, Cin, 3, 3), jnp.float32, -bound, bound)
    # BatchNorm2d default affine params.
    gamma = jnp.ones((Cout,), jnp.float32)
    beta = jnp.zeros((Cout,), jnp.float32)

    ref = reference_forward(x, weight, gamma, beta)

    # Single H-block per image (TH = 16).
    out = simple_conv_forward(x, weight, gamma, beta)
    jax.block_until_ready(out)
    assert out.shape == (N, Cout, H, W)
    assert jnp.allclose(out, ref, rtol=1e-4, atol=1e-4), "mismatch vs reference"

    # Force multi-tile path (TH = 8, 2 H-blocks) to exercise cross-tile BN stats.
    out_tiled = simple_conv_forward(x, weight, gamma, beta, max_tile_rows=128)
    jax.block_until_ready(out_tiled)
    assert jnp.allclose(out_tiled, ref, rtol=1e-4, atol=1e-4), "tiled mismatch vs reference"

    print("KERNEL_OK")
</pallas_src>

<mosaic_0001>
module attributes {stable_mosaic.version = 11 : i64} {
  func.func @conv_stats_kernel(%arg0: i32, %arg1: i32, %arg2: memref<1x18x18x4xf32, #tpu.memory_space<vmem>>, %arg3: memref<3x3x4x128xf32, #tpu.memory_space<vmem>>, %arg4: memref<1x16x16x128xf32, #tpu.memory_space<vmem>>, %arg5: memref<1x1x2x128xf32, #tpu.memory_space<vmem>>) attributes {dimension_semantics = [#tpu.dimension_semantics<parallel>, #tpu.dimension_semantics<parallel>], iteration_bounds = array<i64: 2, 1>, scalar_prefetch = 0 : i64, scratch_operands = 0 : i64, tpu.core_type = #tpu.core_type<tc>, window_params = [{transform_indices = @transform_0, window_bounds = array<i64: 1, 18, 18, 4>}, {pipeline_mode = #tpu.pipeline_mode<synchronous>, transform_indices = @transform_1, window_bounds = array<i64: 3, 3, 4, 128>}, {transform_indices = @transform_2, window_bounds = array<i64: 1, 16, 16, 128>}, {transform_indices = @transform_3, window_bounds = array<i64: 1, 1, 2, 128>}]} {
    %c16_i32 = arith.constant 16 : i32
    %0 = arith.muli %arg1, %c16_i32 : i32
    %1 = tpu.assume_multiple %0, 16 : i32
    %cst = arith.constant 0.000000e+00 : f32
    %2 = vector.broadcast %cst : f32 to vector<256x128xf32>
    %c0_i32 = arith.constant 0 : i32
    %3 = arith.addi %1, %c0_i32 : i32
    %c0 = arith.constant 0 : index
    %4 = arith.index_cast %3 : i32 to index
    %c0_0 = arith.constant 0 : index
    %c0_1 = arith.constant 0 : index
    %5 = vector.load %arg2[%c0, %4, %c0_0, %c0_1] : memref<1x18x18x4xf32, #tpu.memory_space<vmem>>, vector<1x16x16x4xf32>
    %6 = vector.shape_cast %5 : vector<1x16x16x4xf32> to vector<16x16x4xf32>
    %7 = vector.shape_cast %6 : vector<16x16x4xf32> to vector<256x4xf32>
    %c0_2 = arith.constant 0 : index
    %c0_3 = arith.constant 0 : index
    %c0_4 = arith.constant 0 : index
    %c0_5 = arith.constant 0 : index
    %8 = vector.load %arg3[%c0_2, %c0_3, %c0_4, %c0_5] : memref<3x3x4x128xf32, #tpu.memory_space<vmem>>, vector<1x1x4x128xf32>
    %9 = vector.shape_cast %8 : vector<1x1x4x128xf32> to vector<4x128xf32>
    %cst_6 = arith.constant dense<0.000000e+00> : vector<256x128xf32>
    %10 = tpu.matmul %7, %9, %cst_6 {dimension_numbers = #tpu.dot_dimension_numbers<[1], [0], [0], [1], [0, 0, 1, 1], [], []>} : vector<256x4xf32>, vector<4x128xf32>, vector<256x128xf32> -> vector<256x128xf32>
    %11 = arith.addf %2, %10 : vector<256x128xf32>
    %c0_i32_7 = arith.constant 0 : i32
    %12 = arith.addi %1, %c0_i32_7 : i32
    %c0_8 = arith.constant 0 : index
    %13 = arith.index_cast %12 : i32 to index
    %c1 = arith.constant 1 : index
    %c0_9 = arith.constant 0 : index
    %14 = vector.load %arg2[%c0_8, %13, %c1, %c0_9] : memref<1x18x18x4xf32, #tpu.memory_space<vmem>>, vector<1x16x16x4xf32>
    %15 = vector.shape_cast %14 : vector<1x16x16x4xf32> to vector<16x16x4xf32>
    %16 = vector.shape_cast %15 : vector<16x16x4xf32> to vector<256x4xf32>
    %c0_10 = arith.constant 0 : index
    %c1_11 = arith.constant 1 : index
    %c0_12 = arith.constant 0 : index
    %c0_13 = arith.constant 0 : index
    %17 = vector.load %arg3[%c0_10, %c1_11, %c0_12, %c0_13] : memref<3x3x4x128xf32, #tpu.memory_space<vmem>>, vector<1x1x4x128xf32>
    %18 = vector.shape_cast %17 : vector<1x1x4x128xf32> to vector<4x128xf32>
    %cst_14 = arith.constant dense<0.000000e+00> : vector<256x128xf32>
    %19 = tpu.matmul %16, %18, %cst_14 {dimension_numbers = #tpu.dot_dimension_numbers<[1], [0], [0], [1], [0, 0, 1, 1], [], []>} : vector<256x4xf32>, vector<4x128xf32>, vector<256x128xf32> -> vector<256x128xf32>
    %20 = arith.addf %11, %19 : vector<256x128xf32>
    %c0_i32_15 = arith.constant 0 : i32
    %21 = arith.addi %1, %c0_i32_15 : i32
    %c0_16 = arith.constant 0 : index
    %22 = arith.index_cast %21 : i32 to index
    %c2 = arith.constant 2 : index
    %c0_17 = arith.constant 0 : index
    %23 = vector.load %arg2[%c0_16, %22, %c2, %c0_17] : memref<1x18x18x4xf32, #tpu.memory_space<vmem>>, vector<1x16x16x4xf32>
    %24 = vector.shape_cast %23 : vector<1x16x16x4xf32> to vector<16x16x4xf32>
    %25 = vector.shape_cast %24 : vector<16x16x4xf32> to vector<256x4xf32>
    %c0_18 = arith.constant 0 : index
    %c2_19 = arith.constant 2 : index
    %c0_20 = arith.constant 0 : index
    %c0_21 = arith.constant 0 : index
    %26 = vector.load %arg3[%c0_18, %c2_19, %c0_20, %c0_21] : memref<3x3x4x128xf32, #tpu.memory_space<vmem>>, vector<1x1x4x128xf32>
    %27 = vector.shape_cast %26 : vector<1x1x4x128xf32> to vector<4x128xf32>
    %cst_22 = arith.constant dense<0.000000e+00> : vector<256x128xf32>
    %28 = tpu.matmul %25, %27, %cst_22 {dimension_numbers = #tpu.dot_dimension_numbers<[1], [0], [0], [1], [0, 0, 1, 1], [], []>} : vector<256x4xf32>, vector<4x128xf32>, vector<256x128xf32> -> vector<256x128xf32>
    %29 = arith.addf %20, %28 : vector<256x128xf32>
    %c1_i32 = arith.constant 1 : i32
    %30 = arith.addi %1, %c1_i32 : i32
    %c0_23 = arith.constant 0 : index
    %31 = arith.index_cast %30 : i32 to index
    %c0_24 = arith.constant 0 : index
    %c0_25 = arith.constant 0 : index
    %32 = vector.load %arg2[%c0_23, %31, %c0_24, %c0_25] : memref<1x18x18x4xf32, #tpu.memory_space<vmem>>, vector<1x16x16x4xf32>
    %33 = vector.shape_cast %32 : vector<1x16x16x4xf32> to vector<16x16x4xf32>
    %34 = vector.shape_cast %33 : vector<16x16x4xf32> to vector<256x4xf32>
    %c1_26 = arith.constant 1 : index
    %c0_27 = arith.constant 0 : index
    %c0_28 = arith.constant 0 : index
    %c0_29 = arith.constant 0 : index
    %35 = vector.load %arg3[%c1_26, %c0_27, %c0_28, %c0_29] : memref<3x3x4x128xf32, #tpu.memory_space<vmem>>, vector<1x1x4x128xf32>
    %36 = vector.shape_cast %35 : vector<1x1x4x128xf32> to vector<4x128xf32>
    %cst_30 = arith.constant dense<0.000000e+00> : vector<256x128xf32>
    %37 = tpu.matmul %34, %36, %cst_30 {dimension_numbers = #tpu.dot_dimension_numbers<[1], [0], [0], [1], [0, 0, 1, 1], [], []>} : vector<256x4xf32>, vector<4x128xf32>, vector<256x128xf32> -> vector<256x128xf32>
    %38 = arith.addf %29, %37 : vector<256x128xf32>
    %c1_i32_31 = arith.constant 1 : i32
    %39 = arith.addi %1, %c1_i32_31 : i32
    %c0_32 = arith.constant 0 : index
    %40 = arith.index_cast %39 : i32 to index
    %c1_33 = arith.constant 1 : index
    %c0_34 = arith.constant 0 : index
    %41 = vector.load %arg2[%c0_32, %40, %c1_33, %c0_34] : memref<1x18x18x4xf32, #tpu.memory_space<vmem>>, vector<1x16x16x4xf32>
    %42 = vector.shape_cast %41 : vector<1x16x16x4xf32> to vector<16x16x4xf32>
    %43 = vector.shape_cast %42 : vector<16x16x4xf32> to vector<256x4xf32>
    %c1_35 = arith.constant 1 : index
    %c1_36 = arith.constant 1 : index
    %c0_37 = arith.constant 0 : index
    %c0_38 = arith.constant 0 : index
    %44 = vector.load %arg3[%c1_35, %c1_36, %c0_37, %c0_38] : memref<3x3x4x128xf32, #tpu.memory_space<vmem>>, vector<1x1x4x128xf32>
    %45 = vector.shape_cast %44 : vector<1x1x4x128xf32> to vector<4x128xf32>
    %cst_39 = arith.constant dense<0.000000e+00> : vector<256x128xf32>
    %46 = tpu.matmul %43, %45, %cst_39 {dimension_numbers = #tpu.dot_dimension_numbers<[1], [0], [0], [1], [0, 0, 1, 1], [], []>} : vector<256x4xf32>, vector<4x128xf32>, vector<256x128xf32> -> vector<256x128xf32>
    %47 = arith.addf %38, %46 : vector<256x128xf32>
    %c1_i32_40 = arith.constant 1 : i32
    %48 = arith.addi %1, %c1_i32_40 : i32
    %c0_41 = arith.constant 0 : index
    %49 = arith.index_cast %48 : i32 to index
    %c2_42 = arith.constant 2 : index
    %c0_43 = arith.constant 0 : index
    %50 = vector.load %arg2[%c0_41, %49, %c2_42, %c0_43] : memref<1x18x18x4xf32, #tpu.memory_space<vmem>>, vector<1x16x16x4xf32>
    %51 = vector.shape_cast %50 : vector<1x16x16x4xf32> to vector<16x16x4xf32>
    %52 = vector.shape_cast %51 : vector<16x16x4xf32> to vector<256x4xf32>
    %c1_44 = arith.constant 1 : index
    %c2_45 = arith.constant 2 : index
    %c0_46 = arith.constant 0 : index
    %c0_47 = arith.constant 0 : index
    %53 = vector.load %arg3[%c1_44, %c2_45, %c0_46, %c0_47] : memref<3x3x4x128xf32, #tpu.memory_space<vmem>>, vector<1x1x4x128xf32>
    %54 = vector.shape_cast %53 : vector<1x1x4x128xf32> to vector<4x128xf32>
    %cst_48 = arith.constant dense<0.000000e+00> : vector<256x128xf32>
    %55 = tpu.matmul %52, %54, %cst_48 {dimension_numbers = #tpu.dot_dimension_numbers<[1], [0], [0], [1], [0, 0, 1, 1], [], []>} : vector<256x4xf32>, vector<4x128xf32>, vector<256x128xf32> -> vector<256x128xf32>
    %56 = arith.addf %47, %55 : vector<256x128xf32>
    %c2_i32 = arith.constant 2 : i32
    %57 = arith.addi %1, %c2_i32 : i32
    %c0_49 = arith.constant 0 : index
    %58 = arith.index_cast %57 : i32 to index
    %c0_50 = arith.constant 0 : index
    %c0_51 = arith.constant 0 : index
    %59 = vector.load %arg2[%c0_49, %58, %c0_50, %c0_51] : memref<1x18x18x4xf32, #tpu.memory_space<vmem>>, vector<1x16x16x4xf32>
    %60 = vector.shape_cast %59 : vector<1x16x16x4xf32> to vector<16x16x4xf32>
    %61 = vector.shape_cast %60 : vector<16x16x4xf32> to vector<256x4xf32>
    %c2_52 = arith.constant 2 : index
    %c0_53 = arith.constant 0 : index
    %c0_54 = arith.constant 0 : index
    %c0_55 = arith.constant 0 : index
    %62 = vector.load %arg3[%c2_52, %c0_53, %c0_54, %c0_55] : memref<3x3x4x128xf32, #tpu.memory_space<vmem>>, vector<1x1x4x128xf32>
    %63 = vector.shape_cast %62 : vector<1x1x4x128xf32> to vector<4x128xf32>
    %cst_56 = arith.constant dense<0.000000e+00> : vector<256x128xf32>
    %64 = tpu.matmul %61, %63, %cst_56 {dimension_numbers = #tpu.dot_dimension_numbers<[1], [0], [0], [1], [0, 0, 1, 1], [], []>} : vector<256x4xf32>, vector<4x128xf32>, vector<256x128xf32> -> vector<256x128xf32>
    %65 = arith.addf %56, %64 : vector<256x128xf32>
    %c2_i32_57 = arith.constant 2 : i32
    %66 = arith.addi %1, %c2_i32_57 : i32
    %c0_58 = arith.constant 0 : index
    %67 = arith.index_cast %66 : i32 to index
    %c1_59 = arith.constant 1 : index
    %c0_60 = arith.constant 0 : index
    %68 = vector.load %arg2[%c0_58, %67, %c1_59, %c0_60] : memref<1x18x18x4xf32, #tpu.memory_space<vmem>>, vector<1x16x16x4xf32>
    %69 = vector.shape_cast %68 : vector<1x16x16x4xf32> to vector<16x16x4xf32>
    %70 = vector.shape_cast %69 : vector<16x16x4xf32> to vector<256x4xf32>
    %c2_61 = arith.constant 2 : index
    %c1_62 = arith.constant 1 : index
    %c0_63 = arith.constant 0 : index
    %c0_64 = arith.constant 0 : index
    %71 = vector.load %arg3[%c2_61, %c1_62, %c0_63, %c0_64] : memref<3x3x4x128xf32, #tpu.memory_space<vmem>>, vector<1x1x4x128xf32>
    %72 = vector.shape_cast %71 : vector<1x1x4x128xf32> to vector<4x128xf32>
    %cst_65 = arith.constant dense<0.000000e+00> : vector<256x128xf32>
    %73 = tpu.matmul %70, %72, %cst_65 {dimension_numbers = #tpu.dot_dimension_numbers<[1], [0], [0], [1], [0, 0, 1, 1], [], []>} : vector<256x4xf32>, vector<4x128xf32>, vector<256x128xf32> -> vector<256x128xf32>
    %74 = arith.addf %65, %73 : vector<256x128xf32>
    %c2_i32_66 = arith.constant 2 : i32
    %75 = arith.addi %1, %c2_i32_66 : i32
    %c0_67 = arith.constant 0 : index
    %76 = arith.index_cast %75 : i32 to index
    %c2_68 = arith.constant 2 : index
    %c0_69 = arith.constant 0 : index
    %77 = vector.load %arg2[%c0_67, %76, %c2_68, %c0_69] : memref<1x18x18x4xf32, #tpu.memory_space<vmem>>, vector<1x16x16x4xf32>
    %78 = vector.shape_cast %77 : vector<1x16x16x4xf32> to vector<16x16x4xf32>
    %79 = vector.shape_cast %78 : vector<16x16x4xf32> to vector<256x4xf32>
    %c2_70 = arith.constant 2 : index
    %c2_71 = arith.constant 2 : index
    %c0_72 = arith.constant 0 : index
    %c0_73 = arith.constant 0 : index
    %80 = vector.load %arg3[%c2_70, %c2_71, %c0_72, %c0_73] : memref<3x3x4x128xf32, #tpu.memory_space<vmem>>, vector<1x1x4x128xf32>
    %81 = vector.shape_cast %80 : vector<1x1x4x128xf32> to vector<4x128xf32>
    %cst_74 = arith.constant dense<0.000000e+00> : vector<256x128xf32>
    %82 = tpu.matmul %79, %81, %cst_74 {dimension_numbers = #tpu.dot_dimension_numbers<[1], [0], [0], [1], [0, 0, 1, 1], [], []>} : vector<256x4xf32>, vector<4x128xf32>, vector<256x128xf32> -> vector<256x128xf32>
    %83 = arith.addf %74, %82 : vector<256x128xf32>
    %84 = vector.shape_cast %83 : vector<256x128xf32> to vector<1x16x16x128xf32>
    %c0_75 = arith.constant 0 : index
    %c0_76 = arith.constant 0 : index
    %c0_77 = arith.constant 0 : index
    %c0_78 = arith.constant 0 : index
    %85 = vector.load %arg4[%c0_75, %c0_76, %c0_77, %c0_78] : memref<1x16x16x128xf32, #tpu.memory_space<vmem>>, vector<1x16x16x128xf32>
    tpu.vector_store %arg4[%c0_75, %c0_76, %c0_77, %c0_78], %84 {strides = array<i32>} : memref<1x16x16x128xf32, #tpu.memory_space<vmem>>, vector<1x16x16x128xf32>,
    %cst_79 = arith.constant dense<0.000000e+00> : vector<128xf32>
    %86 = vector.multi_reduction <add>, %83, %cst_79 [0] : vector<256x128xf32> to vector<128xf32>
    %87 = vector.shape_cast %86 : vector<128xf32> to vector<1x128xf32>
    %88 = arith.mulf %83, %83 : vector<256x128xf32>
    %cst_80 = arith.constant dense<0.000000e+00> : vector<128xf32>
    %89 = vector.multi_reduction <add>, %88, %cst_80 [0] : vector<256x128xf32> to vector<128xf32>
    %90 = vector.shape_cast %89 : vector<128xf32> to vector<1x128xf32>
    %91 = vector.shape_cast %87 : vector<1x128xf32> to vector<1x1x1x128xf32>
    %c0_81 = arith.constant 0 : index
    %c0_82 = arith.constant 0 : index
    %c0_83 = arith.constant 0 : index
    %c0_84 = arith.constant 0 : index
    %92 = vector.load %arg5[%c0_81, %c0_82, %c0_83, %c0_84] : memref<1x1x2x128xf32, #tpu.memory_space<vmem>>, vector<1x1x1x128xf32>
    tpu.vector_store %arg5[%c0_81, %c0_82, %c0_83, %c0_84], %91 {strides = array<i32>} : memref<1x1x2x128xf32, #tpu.memory_space<vmem>>, vector<1x1x1x128xf32>,
    %93 = vector.shape_cast %90 : vector<1x128xf32> to vector<1x1x1x128xf32>
    %c0_85 = arith.constant 0 : index
    %c0_86 = arith.constant 0 : index
    %c1_87 = arith.constant 1 : index
    %c0_88 = arith.constant 0 : index
    %94 = vector.load %arg5[%c0_85, %c0_86, %c1_87, %c0_88] : memref<1x1x2x128xf32, #tpu.memory_space<vmem>>, vector<1x1x1x128xf32>
    tpu.vector_store %arg5[%c0_85, %c0_86, %c1_87, %c0_88], %93 {strides = array<i32>} : memref<1x1x2x128xf32, #tpu.memory_space<vmem>>, vector<1x1x1x128xf32>,
    return
  }
  func.func @transform_0(%arg0: i32, %arg1: i32) -> (i32, i32, i32, i32) {
    %c0_i32 = arith.constant 0 : i32
    %c0_i32_0 = arith.constant 0 : i32
    %c0_i32_1 = arith.constant 0 : i32
    %c0_i32_2 = arith.constant 0 : i32
    return %arg0, %c0_i32, %c0_i32_0, %c0_i32_1 : i32, i32, i32, i32
  }
  func.func @transform_1(%arg0: i32, %arg1: i32) -> (i32, i32, i32, i32) {
    %c0_i32 = arith.constant 0 : i32
    %c0_i32_0 = arith.constant 0 : i32
    %c0_i32_1 = arith.constant 0 : i32
    %c0_i32_2 = arith.constant 0 : i32
    %c0_i32_3 = arith.constant 0 : i32
    return %c0_i32, %c0_i32_0, %c0_i32_1, %c0_i32_2 : i32, i32, i32, i32
  }
  func.func @transform_2(%arg0: i32, %arg1: i32) -> (i32, i32, i32, i32) {
    %c0_i32 = arith.constant 0 : i32
    %c0_i32_0 = arith.constant 0 : i32
    %c0_i32_1 = arith.constant 0 : i32
    return %arg0, %arg1, %c0_i32, %c0_i32_0 : i32, i32, i32, i32
  }
  func.func @transform_3(%arg0: i32, %arg1: i32) -> (i32, i32, i32, i32) {
    %c0_i32 = arith.constant 0 : i32
    %c0_i32_0 = arith.constant 0 : i32
    %c0_i32_1 = arith.constant 0 : i32
    return %arg0, %arg1, %c0_i32, %c0_i32_0 : i32, i32, i32, i32
  }
}

</mosaic_0001>

<bundles_post_ra>
// kernel: tpu_custom_call.1
= control target key start
LH: loop header
LB: loop body
LE: loop exit
PB: predicated region body
PF: predicated region fallthrough
CT: control target
= control target key end

     0   :  { %9 = vsyncpa [#allocation3], 0  ;;  %s6791_s0 = inlined_call_operand.vmem [shape: f32[2,18,18,4], index: 0, kind: input, shape index: {}]   ;;  %s6792_s1 = inlined_call_operand.vmem [shape: f32[3,3,4,128], index: 1, kind: input, shape index: {}]   ;;  %s6793_s2 = inlined_call_operand.hbm [shape: f32[2,16,16,128], index: 2, kind: output, shape index: {0}]   ;;  %s6794_s3 = inlined_call_operand.hbm [shape: f32[2,1,2,128], index: 3, kind: output, shape index: {1}]  }
   0x1   :  { %11 = vsyncpa [#allocation3 + $0x1], 0 }
   0x2   :  { %12 = vsyncpa [#allocation5], 0 }
   0x3   :  { %14 = vsyncpa [#allocation5 + $0x1], 0  ;;  %s5662_s12 = smov 0   ;;  %s5664_s13 = smov 0  }
   0x4   :  { %s5666_s14 = smov 0   ;;  %s5668_s15 = smov 0  }
   0x5   :  { %s5670_s16 = smov 0   ;;  %s5672_s17 = smov 0  }
   0x6 LB: > { %s3945_s18 = sadd.s32 4294967295, %s5636_s17   ;;  %s3946_s19 = sadd.s32 4294967294, %s5636_s17   ;;  %s5636_s17 = sphi %s5672_s17, %s20_s17   ;;  %s5632_s16 = sphi %s5670_s16, %s6910_s16   ;;  %s5628_s15 = sphi %s5668_s15, %s6909_s15   ;;  %s5624_s14 = sphi %s5666_s14, %s6908_s14   ;;  %s5620_s13 = sphi %s5664_s13, %s6907_s13   ;;  %s5616_s12 = sphi %s5662_s12, %s6906_s12  }
   0x7   : > { %s32_s20 = sadd.s32 1, %s5632_s16  ;;  %s88_s21 = sadd.s32 1, %s5624_s14 }
   0x8   : > { %p34_p0 = scmp.ge.s32.totalorder %s32_s20, 2  ;;  %p98_p1 = scmp.ne.s32.totalorder %s5624_s14, %s5620_s13 }
   0x9   : > { %p99_p2 = scmp.eq.s32.totalorder %s3945_s18, 1  ;;  %p104_p3 = scmp.ne.s32.totalorder %s5620_s13, %s5616_s12 }
   0xa   : > { %s6912_s20 = smov (%p34_p0, %s32_s20), 0  ;;  %p105_p5 = scmp.eq.s32.totalorder %s3946_s19, 1 }
   0xb   : > { %p5702_p4 = por %p99_p2, %p98_p1  ;;  %s83_s23 = ssub.s32 %s5632_s16, %s6912_s20 }
   0xc   : > { %p3949_p6 = scmp.ge.s32.totalorder %s5636_s17, 1  ;;  %p86_p7 = scmp.eq.s32.totalorder %s83_s23, 0 }
   0xd   : > { %p5709_p8 = por %p105_p5, %p104_p3  ;;  %p162_p9 = scmp.lt.s32.totalorder %s5636_s17, 3 }
   0xe   : > { %s5715_s25 = scalar_select %p86_p7, %s5624_s14, %s88_s21  }
   0xf   : > { %p163_p10 = pnand %p3949_p6, %p162_p9 }
  0x11   : > { %166 = sbr.rel (%p163_p10) target bundleno = 575 (0x23f), region = 28 }
  0x18   : > { %v3953_v0 = vld [vmem:[%s6792_s1 + $0x4] sm:$0xf]  ;;  %vm364_vm0 = vcmask 1043456   ;;  %v5723_v1 = vld [vmem:[%s6792_s1 + $0x10] sm:$0xf]  ;;  %p191_p11 = scmp.lt.s32.totalorder %s5628_s15, 1 }
  0x19   : > { %4755 = vmatprep.subr.msk.mxu1 %vm364_vm0, %v3953_v0  ;;  %4955 = vmatprep.subr.msk.mxu0 %vm364_vm0, %v5723_v1  ;;  %v232_v2 = vld [vmem:[%s6792_s1] sm:$0xf]  ;;  %v4218_v3 = vld [vmem:[%s6792_s1 + $0x14] sm:$0xf]  ;;  %vm267_vm1 = vcmask 31744   ;;  %s6658_s5 = sand.u32 1, %s5620_s13  }
  0x1a   : > { %4756 = vmatpush3.msk.msra.mxu1 %vm364_vm0, %v3953_v0  ;;  %4956 = vmatpush3.msk.msra.mxu0 %vm364_vm0, %v5723_v1  ;;  %s192_s7 = scalar_select %p191_p11, %s5628_s15, 1  ;;  %v4284_v9 = vld [vmem:[%s6792_s1 + $0x18] sm:$0xf]  ;;  %v5763_v10 = vld [vmem:[%s6792_s1 + $0x8] sm:$0xf] }
  0x1b   : > { %4805 = vmatprep.subr.msk.mxu1 %vm364_vm0, %v232_v2  ;;  %5005 = vmatprep.subr.msk.mxu0 %vm364_vm0, %v4218_v3  ;;  %v5882_v28 = vld [vmem:[%s6792_s1 + $0x1c] sm:$0xf]  ;;  %v6045_v61 = vld [vmem:[%s6792_s1 + $0xc] sm:$0xf]  ;;  %s3950_s6 = sshll.u32 %s6658_s5, 8  ;;  %s3794_s19 = scalar_lea.sflag [#allocation3], %s6658_s5 }
  0x1c   : > { %s5463_s8 = smul.u32 432, %s192_s7  ;;  %s6665_s7 = scalar_lea.vmem [#allocation2], %s3950_s6 }
  0x1d   : > { %s3815_s9 = sshll.u32 %s6665_s7, 4  ;;  %s5638_s23 = smov [#allocation2]   ;;  %s6710_s9 = int_to_ptr.vmem [resolvable:$true] %s3815_s9 }
  0x1e   : > { %s5744_s11 = scalar_lea.vmem %s6791_s0, %s5463_s8  ;;  %s4457_s8 = sshll.u32 %s5628_s15, 12 }
  0x1f   : > { %v233_v4 = vld [vmem:[%s5744_s11 + $0x1] sm:$0xff]  ;;  %v4120_v5 = vld [vmem:[%s5744_s11 + $0x19] sm:$0xff]  ;;  %v234_v6 = vld [vmem:[%s5744_s11 + $0x9] sm:$0xff]  ;;  %s6708_s18 = scalar_lea.hbm %s6793_s2, %s4457_s8  ;;  %s5526_s21 = scalar_lea.vmem %s6710_s9, 4096 }
  0x20   : > { %4757 = vmatprep.mubr.msk.f32.mxu1 %vm267_vm1, %v233_v4  ;;  %4957 = vmatprep.mubr.msk.f32.mxu0 %vm267_vm1, %v4120_v5  ;;  %v4121_v7 = vld [vmem:[%s5744_s11 + $0x21] sm:$0xff]  ;;  %v5753_v8 = vld [vmem:[%s5744_s11 + $0x31] sm:$0xff]  ;;  %v5768_v11 = vld [vmem:[%s5744_s11 + $0x39] sm:$0xff]  ;;  %p5527_p12 = scmp.ne.s32.totalorder %s6710_s9, %s5526_s21  ;;  %s5530_s26 = sshll.u32 %s5638_s23, 4  ;;  %s5531_s26 = int_to_ptr.vmem [resolvable:$false] %s5530_s26 }
  0x21   : > { %4758 = vmatmul.mubr.msk.f32.vlgmr.msra.gmra.mrb[0].mxu1 %vm267_vm1, %v234_v6  ;;  %4958 = vmatmul.mubr.msk.f32.vlgmr.msra.gmra.mrb[0].mxu0 %vm267_vm1, %v4121_v7  ;;  %v5774_v12 = vld [vmem:[%s5744_s11 + $0x49] sm:$0xff]  ;;  %v5787_v13 = vld [vmem:[%s5744_s11 + $0x51] sm:$0xff]  ;;  %v5790_v14 = vld [vmem:[%s5744_s11 + $0x61] sm:$0xff]  ;;  %s5532_s27 = scalar_lea.vmem %s5531_s26, 8192  ;;  %p5533_p1 = scmp.lt.s32.totalorder %s6710_s9, %s5531_s26 }
  0x22   : > { %4806 = vmatpush3.msk.msra.mxu1 %vm364_vm0, %v232_v2  ;;  %5006 = vmatpush3.msk.msra.mxu0 %vm364_vm0, %v4218_v3  ;;  %v5801_v15 = vld [vmem:[%s5744_s11 + $0x69] sm:$0xff]  ;;  %v5804_v16 = vld [vmem:[%s5744_s11 + $0x79] sm:$0xff]  ;;  %v5815_v17 = vld [vmem:[%s5744_s11 + $0x81] sm:$0xff]  ;;  %p5528_p13 = pnand %p5527_p12, %p5702_p4  ;;  %p5534_p2 = scmp.lt.s32.totalorder %s5532_s27, %s5526_s21 }
  0x23   : > { %4760 = vmatprep.mubr.msk.f32.mxu1 %vm267_vm1, %v4120_v5  ;;  %4960 = vmatprep.mubr.msk.f32.mxu0 %vm267_vm1, %v5753_v8  ;;  %v5818_v18 = vld [vmem:[%s5744_s11 + $0x91] sm:$0xff]  ;;  %v5829_v19 = vld [vmem:[%s5744_s11 + $0x99] sm:$0xff]  ;;  %v5832_v20 = vld [vmem:[%s5744_s11 + $0xa9] sm:$0xff] }
  0x24   : > { %5055 = vmatprep.subr.msk.mxu0 %vm364_vm0, %v4284_v9  ;;  %4855 = vmatprep.subr.msk.mxu1 %vm364_vm0, %v5763_v10  ;;  %v5843_v21 = vld [vmem:[%s5744_s11 + $0xb1] sm:$0xff]  ;;  %v5846_v22 = vld [vmem:[%s5744_s11 + $0xc1] sm:$0xff]  ;;  %v5857_v23 = vld [vmem:[%s5744_s11 + $0xc9] sm:$0xff]  ;;  %p5529_p0 = pneg %p5528_p13  ;;  %p5535_p3 = por %p5534_p2, %p5533_p1 }
  0x25   : > { %4761 = vmatmul.mubr.msk.f32.gmra.mrb[2].mxu1 %vm267_vm1, %v4121_v7  ;;  %4961 = vmatmul.mubr.msk.f32.gmra.mrb[2].mxu0 %vm267_vm1, %v5768_v11  ;;  %v5860_v24 = vld [vmem:[%s5744_s11 + $0x1a] sm:$0xff]  ;;  %v5871_v25 = vld [vmem:[%s5744_s11 + $0x22] sm:$0xff]  ;;  %v5877_v27 = vld [vmem:[%s5744_s11 + $0x32] sm:$0xff] }
  0x26   : > { %4763 = vmatprep.mubr.msk.f32.mxu1 %vm267_vm1, %v5753_v8  ;;  %4963 = vmatprep.mubr.msk.f32.mxu0 %vm267_vm1, %v5774_v12  ;;  %v5874_v26 = vld [vmem:[%s5744_s11 + $0xd9] sm:$0xff]  ;;  %v5892_v29 = vld [vmem:[%s5744_s11 + $0xe1] sm:$0xff]  ;;  %v5900_v31 = vld [vmem:[%s5744_s11 + $0xf1] sm:$0xff]  ;;  %p5536_p5 = pnand %p5535_p3, %p5529_p0 }
  0x27   : > { %6842 = vst [vmem:[#allocation8_spill] sm:$0xff] %v5892_v29  ;;  %v5895_v30 = vld [vmem:[%s5744_s11 + $0x3a] sm:$0xff]  ;;  %6843 = vst [vmem:[#allocation9_spill] sm:$0xff] %v5900_v31  ;;  %v5903_v32 = vld [vmem:[%s5744_s11 + $0x4a] sm:$0xff] }
  0x28   : > { %v5916_v33 = vld [vmem:[%s5744_s11 + $0xf9] sm:$0xff]  ;;  %v5922_v35 = vld [vmem:[%s5744_s11 + $0x109] sm:$0xff]  ;;  %v5936_v37 = vld [vmem:[%s5744_s11 + $0x111] sm:$0xff] }
  0x29   : > { %4764 = vmatmul.mubr.msk.f32.gmra.mrb[4].mxu1 %vm267_vm1, %v5768_v11  ;;  %4964 = vmatmul.mubr.msk.f32.gmra.mrb[4].mxu0 %vm267_vm1, %v5787_v13  ;;  %6844 = vst [vmem:[#allocation10_spill] sm:$0xff] %v5916_v33  ;;  %v5919_v34 = vld [vmem:[%s5744_s11 + $0x52] sm:$0xff]  ;;  %6845 = vst [vmem:[#allocation11_spill] sm:$0xff] %v5922_v35  ;;  %v5925_v36 = vld [vmem:[%s5744_s11 + $0x62] sm:$0xff] }
  0x2a   : > { %4766 = vmatprep.mubr.msk.f32.mxu1 %vm267_vm1, %v5774_v12  ;;  %4966 = vmatprep.mubr.msk.f32.mxu0 %vm267_vm1, %v5790_v14  ;;  %6846 = vst [vmem:[#allocation12_spill] sm:$0xff] %v5936_v37  ;;  %v5939_v38 = vld [vmem:[%s5744_s11 + $0x6a] sm:$0xff]  ;;  %v5942_v39 = vld [vmem:[%s5744_s11 + $0x121] sm:$0xff]  ;;  %v5962_v43 = vld [vmem:[%s5744_s11 + $0x139] sm:$0xff] }
  0x2b   : > { %6847 = vst [vmem:[#allocation13_spill] sm:$0xff] %v5942_v39  ;;  %v5945_v40 = vld [vmem:[%s5744_s11 + $0x7a] sm:$0xff]  ;;  %v5956_v41 = vld [vmem:[%s5744_s11 + $0x129] sm:$0xff]  ;;  %6849 = vst [vmem:[#allocation15_spill] sm:$0xff] %v5962_v43 }
  0x2c   : > { %6848 = vst [vmem:[#allocation14_spill] sm:$0xff] %v5956_v41  ;;  %v5959_v42 = vld [vmem:[%s5744_s11 + $0x82] sm:$0xff]  ;;  %v5965_v44 = vld [vmem:[%s5744_s11 + $0x92] sm:$0xff]  ;;  %v5979_v46 = vld [vmem:[%s5744_s11 + $0x9a] sm:$0xff] }
  0x2d   : > { %4767 = vmatmul.mubr.msk.f32.gmra.mrb[6].mxu1 %vm267_vm1, %v5787_v13  ;;  %4967 = vmatmul.mubr.msk.f32.gmra.mrb[6].mxu0 %vm267_vm1, %v5801_v15  ;;  %v5976_v45 = vld [vmem:[%s5744_s11 + $0x141] sm:$0xff]  ;;  %v5982_v47 = vld [vmem:[%s5744_s11 + $0x151] sm:$0xff]  ;;  %v5996_v49 = vld [vmem:[%s5744_s11 + $0x159] sm:$0xff] }
  0x2e   : > { %4769 = vmatprep.mubr.msk.f32.mxu1 %vm267_vm1, %v5790_v14  ;;  %4969 = vmatprep.mubr.msk.f32.mxu0 %vm267_vm1, %v5804_v16  ;;  %6850 = vst [vmem:[#allocation16_spill] sm:$0xff] %v5976_v45  ;;  %6851 = vst [vmem:[#allocation17_spill] sm:$0xff] %v5982_v47  ;;  %v5985_v48 = vld [vmem:[%s5744_s11 + $0xaa] sm:$0xff]  ;;  %v5999_v50 = vld [vmem:[%s5744_s11 + $0xb2] sm:$0xff] }
  0x2f   : > { %6852 = vst [vmem:[#allocation18_spill] sm:$0xff] %v5996_v49  ;;  %v6002_v51 = vld [vmem:[%s5744_s11 + $0x169] sm:$0xff]  ;;  %v6016_v53 = vld [vmem:[%s5744_s11 + $0x171] sm:$0xff]  ;;  %v200_v55 = vld [vmem:[%s5744_s11] sm:$0xff] }
  0x30   : > { %6853 = vst [vmem:[#allocation19_spill] sm:$0xff] %v6002_v51  ;;  %v6005_v52 = vld [vmem:[%s5744_s11 + $0xc2] sm:$0xff]  ;;  %6854 = vst [vmem:[#allocation20_spill] sm:$0xff] %v6016_v53  ;;  %v6019_v54 = vld [vmem:[%s5744_s11 + $0xca] sm:$0xff] }
  0x31   : > { %4770 = vmatmul.mubr.msk.f32.gmra.mrb[8].mxu1 %vm267_vm1, %v5801_v15  ;;  %4970 = vmatmul.mubr.msk.f32.gmra.mrb[8].mxu0 %vm267_vm1, %v5815_v17  ;;  %v6023_v56 = vld [vmem:[%s5744_s11 + $0xda] sm:$0xff]  ;;  %v201_v57 = vld [vmem:[%s5744_s11 + $0x8] sm:$0xff]  ;;  %v6040_v60 = vld [vmem:[%s5744_s11 + $0xf2] sm:$0xff] }
  0x32   : > { %4772 = vmatprep.mubr.msk.f32.mxu1 %vm267_vm1, %v5804_v16  ;;  %4972 = vmatprep.mubr.msk.f32.mxu0 %vm267_vm1, %v5818_v18  ;;  %v6034_v58 = vld [vmem:[%s5744_s11 + $0xe2] sm:$0xff]  ;;  %v6037_v59 = vld [vmem:[%s5744_s11 + $0x18] sm:$0xff]  ;;  %v6063_v0 = vld [vmem:[%s5744_s11 + $0x30] sm:$0xff] }
  0x33   : > { %6855 = vst [vmem:[#allocation21_spill] sm:$0xff] %v6037_v59  ;;  %v6055_v62 = vld [vmem:[%s5744_s11 + $0x20] sm:$0xff]  ;;  %6857 = vst [vmem:[#allocation23_spill] sm:$0xff] %v6063_v0  ;;  %v6066_v2 = vld [vmem:[%s5744_s11 + $0x10a] sm:$0xff] }
  0x34   : > { %6856 = vst [vmem:[#allocation22_spill] sm:$0xff] %v6055_v62  ;;  %v6058_v63 = vld [vmem:[%s5744_s11 + $0xfa] sm:$0xff]  ;;  %v6082_v4 = vld [vmem:[%s5744_s11 + $0x112] sm:$0xff]  ;;  %v6085_v5 = vld [vmem:[%s5744_s11 + $0x48] sm:$0xff] }
  0x35   : > { %4773 = vmatmul.mubr.msk.f32.gmra.mrb[10].mxu1 %vm267_vm1, %v5815_v17  ;;  %4973 = vmatmul.mubr.msk.f32.gmra.mrb[10].mxu0 %vm267_vm1, %v5829_v19  ;;  %v6079_v3 = vld [vmem:[%s5744_s11 + $0x38] sm:$0xff]  ;;  %6859 = vst [vmem:[#allocation25_spill] sm:$0xff] %v6085_v5  ;;  %v6088_v6 = vld [vmem:[%s5744_s11 + $0x122] sm:$0xff]  ;;  %v6099_v7 = vld [vmem:[%s5744_s11 + $0x50] sm:$0xff] }
  0x36   : > { %4775 = vmatprep.mubr.msk.f32.mxu1 %vm267_vm1, %v5818_v18  ;;  %4975 = vmatprep.mubr.msk.f32.mxu0 %vm267_vm1, %v5832_v20  ;;  %6858 = vst [vmem:[#allocation24_spill] sm:$0xff] %v6079_v3  ;;  %6860 = vst [vmem:[#allocation26_spill] sm:$0xff] %v6099_v7 }
  0x39   : > { %4776 = vmatmul.mubr.msk.f32.gmra.mrb[12].mxu1 %vm267_vm1, %v5829_v19  ;;  %4976 = vmatmul.mubr.msk.f32.gmra.mrb[12].mxu0 %vm267_vm1, %v5843_v21 }
  0x3a   : > { %4778 = vmatprep.mubr.msk.f32.mxu1 %vm267_vm1, %v5832_v20  ;;  %4978 = vmatprep.mubr.msk.f32.mxu0 %vm267_vm1, %v5846_v22 }
  0x3d   : > { %4779 = vmatmul.mubr.msk.f32.gmra.mrb[14].mxu1 %vm267_vm1, %v5843_v21  ;;  %4979 = vmatmul.mubr.msk.f32.gmra.mrb[14].mxu0 %vm267_vm1, %v5857_v23 }
  0x3e   : > { %4781 = vmatprep.mubr.msk.f32.mxu1 %vm267_vm1, %v5846_v22  ;;  %5007 = vmatprep.mubr.msk.f32.mxu0 %vm267_vm1, %v5860_v24 }
  0x41   : > { %4782 = vmatmul.mubr.msk.f32.gmra.mrb[16].mxu1 %vm267_vm1, %v5857_v23  ;;  %5008 = vmatmul.mubr.msk.f32.vlgmr.msra.gmra.mrb[0].mxu0 %vm267_vm1, %v5871_v25 }
  0x42   : > { %5056 = vmatpush3.msk.msra.mxu0 %vm364_vm0, %v4284_v9  ;;  %4784 = vmatprep.mubr.msk.f32.mxu1 %vm267_vm1, %v5874_v26  ;;  %v6102_v9 = vld [vmem:[%s5744_s11 + $0x12a] sm:$0xff] }
  0x43   : > { %5010 = vmatprep.mubr.msk.f32.mxu0 %vm267_vm1, %v5877_v27  ;;  %5105 = vmatprep.subr.msk.mxu0 %vm364_vm0, %v5882_v28 }
  0x45   : > { %4785 = vmatmul.mubr.msk.f32.gmra.mrb[18].mxu1 %vm267_vm1, %v5892_v29  ;;  %5011 = vmatmul.mubr.msk.f32.gmra.mrb[2].mxu0 %vm267_vm1, %v5895_v30  ;;  %v6199_v29 = vld [vmem:[%s5744_s11 + $0xd8] sm:$0xff] }
  0x46   : > { %4787 = vmatprep.mubr.msk.f32.mxu1 %vm267_vm1, %v5900_v31  ;;  %5013 = vmatprep.mubr.msk.f32.mxu0 %vm267_vm1, %v5903_v32  ;;  %v6182_v31 = vld [vmem:[%s5744_s11 + $0x18a] sm:$0xff] }
  0x47   : > { %6871 = vst [vmem:[#allocation37_spill] sm:$0xff] %v6182_v31 }
  0x49   : > { %4788 = vmatmul.mubr.msk.f32.gmra.mrb[20].mxu1 %vm267_vm1, %v5916_v33  ;;  %5014 = vmatmul.mubr.msk.f32.gmra.mrb[4].mxu0 %vm267_vm1, %v5919_v34  ;;  %v6168_v33 = vld [vmem:[%s5744_s11 + $0x182] sm:$0xff] }
  0x4a   : > { %4790 = vmatprep.mubr.msk.f32.mxu1 %vm267_vm1, %v5922_v35  ;;  %5016 = vmatprep.mubr.msk.f32.mxu0 %vm267_vm1, %v5925_v36  ;;  %v6165_v35 = vld [vmem:[%s5744_s11 + $0xa8] sm:$0xff]  ;;  %6869 = vst [vmem:[#allocation35_spill] sm:$0xff] %v6168_v33 }
  0x4b   : > { %6868 = vst [vmem:[#allocation34_spill] sm:$0xff] %v6165_v35 }
  0x4d   : > { %4791 = vmatmul.mubr.msk.f32.gmra.mrb[22].mxu1 %vm267_vm1, %v5936_v37  ;;  %5017 = vmatmul.mubr.msk.f32.gmra.mrb[6].mxu0 %vm267_vm1, %v5939_v38  ;;  %v6162_v37 = vld [vmem:[%s5744_s11 + $0x172] sm:$0xff] }
  0x4e   : > { %4793 = vmatprep.mubr.msk.f32.mxu1 %vm267_vm1, %v5942_v39  ;;  %5019 = vmatprep.mubr.msk.f32.mxu0 %vm267_vm1, %v5945_v40  ;;  %v6159_v39 = vld [vmem:[%s5744_s11 + $0x98] sm:$0xff]  ;;  %6867 = vst [vmem:[#allocation33_spill] sm:$0xff] %v6162_v37 }
  0x4f   : > { %6866 = vst [vmem:[#allocation32_spill] sm:$0xff] %v6159_v39 }
  0x51   : > { %4794 = vmatmul.mubr.msk.f32.gmra.mrb[24].mxu1 %vm267_vm1, %v5956_v41  ;;  %5020 = vmatmul.mubr.msk.f32.gmra.mrb[8].mxu0 %vm267_vm1, %v5959_v42  ;;  %v6148_v41 = vld [vmem:[%s5744_s11 + $0x16a] sm:$0xff] }
  0x52   : > { %4796 = vmatprep.mubr.msk.f32.mxu1 %vm267_vm1, %v5962_v43  ;;  %5022 = vmatprep.mubr.msk.f32.mxu0 %vm267_vm1, %v5965_v44  ;;  %v6145_v43 = vld [vmem:[%s5744_s11 + $0x90] sm:$0xff] }
  0x53   : > { %6865 = vst [vmem:[#allocation31_spill] sm:$0xff] %v6145_v43 }
  0x55   : > { %4797 = vmatmul.mubr.msk.f32.gmra.mrb[26].mxu1 %vm267_vm1, %v5976_v45  ;;  %5023 = vmatmul.mubr.msk.f32.gmra.mrb[10].mxu0 %vm267_vm1, %v5979_v46  ;;  %v6142_v45 = vld [vmem:[%s5744_s11 + $0x15a] sm:$0xff] }
  0x56   : > { %4799 = vmatprep.mubr.msk.f32.mxu1 %vm267_vm1, %v5982_v47  ;;  %5025 = vmatprep.mubr.msk.f32.mxu0 %vm267_vm1, %v5985_v48  ;;  %v6139_v47 = vld [vmem:[%s5744_s11 + $0x80] sm:$0xff] }
  0x57   : > { %6864 = vst [vmem:[#allocation30_spill] sm:$0xff] %v6139_v47 }
  0x59   : > { %4800 = vmatmul.mubr.msk.f32.gmra.mrb[28].mxu1 %vm267_vm1, %v5996_v49  ;;  %5026 = vmatmul.mubr.msk.f32.gmra.mrb[12].mxu0 %vm267_vm1, %v5999_v50  ;;  %v6128_v49 = vld [vmem:[%s5744_s11 + $0x152] sm:$0xff] }
  0x5a   : > { %4802 = vmatprep.mubr.msk.f32.mxu1 %vm267_vm1, %v6002_v51  ;;  %5028 = vmatprep.mubr.msk.f32.mxu0 %vm267_vm1, %v6005_v52  ;;  %v6125_v51 = vld [vmem:[%s5744_s11 + $0x78] sm:$0xff] }
  0x5b   : > { %6863 = vst [vmem:[#allocation29_spill] sm:$0xff] %v6125_v51 }
  0x5d   : > { %4803 = vmatmul.mubr.msk.f32.gmra.mrb[30].mxu1 %vm267_vm1, %v6016_v53  ;;  %5029 = vmatmul.mubr.msk.f32.gmra.mrb[14].mxu0 %vm267_vm1, %v6019_v54  ;;  %v6122_v53 = vld [vmem:[%s5744_s11 + $0x142] sm:$0xff] }
  0x5e   : > { %4807 = vmatprep.mubr.msk.f32.mxu1 %vm267_vm1, %v200_v55  ;;  %5031 = vmatprep.mubr.msk.f32.mxu0 %vm267_vm1, %v6023_v56  ;;  %v6108_v55 = vld [vmem:[%s5744_s11 + $0x13a] sm:$0xff] }
  0x61   : > { %4808 = vmatmul.mubr.msk.f32.vlgmr.msra.gmra.mrb[0].mxu1 %vm267_vm1, %v201_v57  ;;  %5032 = vmatmul.mubr.msk.f32.gmra.mrb[16].mxu0 %vm267_vm1, %v6034_v58  ;;  %v6119_v57 = vld [vmem:[%s5744_s11 + $0x68] sm:$0xff] }
  0x62   : > { %4856 = vmatpush3.msk.msra.mxu1 %vm364_vm0, %v5763_v10  ;;  %4810 = vmatprep.mubr.msk.f32.mxu1 %vm267_vm1, %v6037_v59  ;;  %v6105_v10 = vld [vmem:[%s5744_s11 + $0x60] sm:$0xff]  ;;  %6862 = vst [vmem:[#allocation28_spill] sm:$0xff] %v6119_v57 }
  0x63   : > { %5034 = vmatprep.mubr.msk.f32.mxu0 %vm267_vm1, %v6040_v60  ;;  %4905 = vmatprep.subr.msk.mxu1 %vm364_vm0, %v6045_v61  ;;  %6861 = vst [vmem:[#allocation27_spill] sm:$0xff] %v6105_v10  ;;  %v6185_v59 = vld [vmem:[%s5744_s11 + $0xc0] sm:$0xff] }
  0x65   : > { %4811 = vmatmul.mubr.msk.f32.gmra.mrb[2].mxu1 %vm267_vm1, %v6055_v62  ;;  %5035 = vmatmul.mubr.msk.f32.gmra.mrb[18].mxu0 %vm267_vm1, %v6058_v63  ;;  %v6179_v62 = vld [vmem:[%s5744_s11 + $0xb0] sm:$0xff] }
  0x66   : > { %4813 = vmatprep.mubr.msk.f32.mxu1 %vm267_vm1, %v6063_v0  ;;  %5037 = vmatprep.mubr.msk.f32.mxu0 %vm267_vm1, %v6066_v2  ;;  %6870 = vst [vmem:[#allocation36_spill] sm:$0xff] %v6179_v62 }
  0x69   : > { %4814 = vmatmul.mubr.msk.f32.gmra.mrb[4].mxu1 %vm267_vm1, %v6079_v3  ;;  %5038 = vmatmul.mubr.msk.f32.gmra.mrb[20].mxu0 %vm267_vm1, %v6082_v4 }
  0x6a   : > { %4816 = vmatprep.mubr.msk.f32.mxu1 %vm267_vm1, %v6085_v5  ;;  %5040 = vmatprep.mubr.msk.f32.mxu0 %vm267_vm1, %v6088_v6 }
  0x6d   : > { %4817 = vmatmul.mubr.msk.f32.gmra.mrb[6].mxu1 %vm267_vm1, %v6099_v7  ;;  %5041 = vmatmul.mubr.msk.f32.gmra.mrb[22].mxu0 %vm267_vm1, %v6102_v9 }
  0x6e   : > { %4819 = vmatprep.mubr.msk.f32.mxu1 %vm267_vm1, %v6105_v10  ;;  %5043 = vmatprep.mubr.msk.f32.mxu0 %vm267_vm1, %v6108_v55 }
  0x71   : > { %4820 = vmatmul.mubr.msk.f32.gmra.mrb[8].mxu1 %vm267_vm1, %v6119_v57  ;;  %5044 = vmatmul.mubr.msk.f32.gmra.mrb[24].mxu0 %vm267_vm1, %v6122_v53 }
  0x72   : > { %4822 = vmatprep.mubr.msk.f32.mxu1 %vm267_vm1, %v6125_v51  ;;  %5046 = vmatprep.mubr.msk.f32.mxu0 %vm267_vm1, %v6128_v49 }
  0x75   : > { %4823 = vmatmul.mubr.msk.f32.gmra.mrb[10].mxu1 %vm267_vm1, %v6139_v47  ;;  %5047 = vmatmul.mubr.msk.f32.gmra.mrb[26].mxu0 %vm267_vm1, %v6142_v45 }
  0x76   : > { %4825 = vmatprep.mubr.msk.f32.mxu1 %vm267_vm1, %v6145_v43  ;;  %5049 = vmatprep.mubr.msk.f32.mxu0 %vm267_vm1, %v6148_v41 }
  0x79   : > { %4826 = vmatmul.mubr.msk.f32.gmra.mrb[12].mxu1 %vm267_vm1, %v6159_v39  ;;  %5050 = vmatmul.mubr.msk.f32.gmra.mrb[28].mxu0 %vm267_vm1, %v6162_v37  ;;  %v6204_v37 = vld [vmem:[%s6792_s1 + $0x20] sm:$0xf] }
  0x7a   : > { %4828 = vmatprep.mubr.msk.f32.mxu1 %vm267_vm1, %v6165_v35  ;;  %5052 = vmatprep.mubr.msk.f32.mxu0 %vm267_vm1, %v6168_v33  ;;  %v6196_v33 = vld [vmem:[%s5744_s11 + $0xc8] sm:$0xff] }
  0x7b   : > { %6872 = vst [vmem:[#allocation38_spill] sm:$0xff] %v6196_v33 }
  0x7d   : > { %4829 = vmatmul.mubr.msk.f32.gmra.mrb[14].mxu1 %vm267_vm1, %v6179_v62  ;;  %5053 = vmatmul.mubr.msk.f32.gmra.mrb[30].mxu0 %vm267_vm1, %v6182_v31  ;;  %v6215_v31 = vld [vmem:[%s5744_s11 + $0xe0] sm:$0xff] }
  0x7e   : > { %4831 = vmatprep.mubr.msk.f32.mxu1 %vm267_vm1, %v6185_v59  ;;  %5057 = vmatprep.mubr.msk.f32.mxu0 %vm267_vm1, %v6063_v0  ;;  %v6220_v0 = vld [vmem:[%s5744_s11 + $0xf0] sm:$0xff] }
  0x81   : > { %4832 = vmatmul.mubr.msk.f32.gmra.mrb[16].mxu1 %vm267_vm1, %v6196_v33  ;;  %5058 = vmatmul.mubr.msk.f32.vlgmr.msra.gmra.mrb[0].mxu0 %vm267_vm1, %v6079_v3  ;;  %v917_v3 = vld [vmem:[%s5744_s11 + $0x2] sm:$0xff] }
  0x82   : > { %5106 = vmatpush3.msk.msra.mxu0 %vm364_vm0, %v5882_v28  ;;  %4834 = vmatprep.mubr.msk.f32.mxu1 %vm267_vm1, %v6199_v29  ;;  %v6233_v28 = vld [vmem:[%s5744_s11 + $0xf8] sm:$0xff] }
  0x83   : > { %5060 = vmatprep.mubr.msk.f32.mxu0 %vm267_vm1, %v6085_v5  ;;  %5155 = vmatprep.subr.msk.mxu0 %vm364_vm0, %v6204_v37  ;;  %v6236_v5 = vld [vmem:[%s5744_s11 + $0x108] sm:$0xff] }
  0x85   : > { %4835 = vmatmul.mubr.msk.f32.gmra.mrb[18].mxu1 %vm267_vm1, %v6215_v31  ;;  %5061 = vmatmul.mubr.msk.f32.gmra.mrb[2].mxu0 %vm267_vm1, %v6099_v7  ;;  %v6247_v7 = vld [vmem:[%s5744_s11 + $0x110] sm:$0xff] }
  0x86   : > { %4837 = vmatprep.mubr.msk.f32.mxu1 %vm267_vm1, %v6220_v0  ;;  %5063 = vmatprep.mubr.msk.f32.mxu0 %vm267_vm1, %v6105_v10  ;;  %v6250_v10 = vld [vmem:[%s5744_s11 + $0x120] sm:$0xff] }
  0x89   : > { %4838 = vmatmul.mubr.msk.f32.gmra.mrb[20].mxu1 %vm267_vm1, %v6233_v28  ;;  %5064 = vmatmul.mubr.msk.f32.gmra.mrb[4].mxu0 %vm267_vm1, %v6119_v57  ;;  %v6261_v57 = vld [vmem:[%s5744_s11 + $0x128] sm:$0xff] }
  0x8a   : > { %4840 = vmatprep.mubr.msk.f32.mxu1 %vm267_vm1, %v6236_v5  ;;  %5066 = vmatprep.mubr.msk.f32.mxu0 %vm267_vm1, %v6125_v51  ;;  %v6264_v51 = vld [vmem:[%s5744_s11 + $0x138] sm:$0xff] }
  0x8d   : > { %4841 = vmatmul.mubr.msk.f32.gmra.mrb[22].mxu1 %vm267_vm1, %v6247_v7  ;;  %5067 = vmatmul.mubr.msk.f32.gmra.mrb[6].mxu0 %vm267_vm1, %v6139_v47  ;;  %v6275_v47 = vld [vmem:[%s5744_s11 + $0x140] sm:$0xff] }
  0x8e   : > { %4843 = vmatprep.mubr.msk.f32.mxu1 %vm267_vm1, %v6250_v10  ;;  %5069 = vmatprep.mubr.msk.f32.mxu0 %vm267_vm1, %v6145_v43  ;;  %v6278_v43 = vld [vmem:[%s5744_s11 + $0x150] sm:$0xff] }
  0x91   : > { %4844 = vmatmul.mubr.msk.f32.gmra.mrb[24].mxu1 %vm267_vm1, %v6261_v57  ;;  %5070 = vmatmul.mubr.msk.f32.gmra.mrb[8].mxu0 %vm267_vm1, %v6159_v39  ;;  %v6289_v39 = vld [vmem:[%s5744_s11 + $0x158] sm:$0xff] }
  0x92   : > { %4846 = vmatprep.mubr.msk.f32.mxu1 %vm267_vm1, %v6264_v51  ;;  %5072 = vmatprep.mubr.msk.f32.mxu0 %vm267_vm1, %v6165_v35  ;;  %v6292_v35 = vld [vmem:[%s5744_s11 + $0x168] sm:$0xff] }
  0x95   : > { %4847 = vmatmul.mubr.msk.f32.gmra.mrb[26].mxu1 %vm267_vm1, %v6275_v47  ;;  %5073 = vmatmul.mubr.msk.f32.gmra.mrb[10].mxu0 %vm267_vm1, %v6179_v62  ;;  %v6303_v62 = vld [vmem:[%s5744_s11 + $0x170] sm:$0xff] }
  0x96   : > { %4849 = vmatprep.mubr.msk.f32.mxu1 %vm267_vm1, %v6278_v43  ;;  %5075 = vmatprep.mubr.msk.f32.mxu0 %vm267_vm1, %v6185_v59 }
  0x99   : > { %4850 = vmatmul.mubr.msk.f32.gmra.mrb[28].mxu1 %vm267_vm1, %v6289_v39  ;;  %5076 = vmatmul.mubr.msk.f32.gmra.mrb[12].mxu0 %vm267_vm1, %v6196_v33  ;;  %v918_v33 = vld [vmem:[%s5744_s11 + $0xa] sm:$0xff] }
  0x9a   : > { %4852 = vmatprep.mubr.msk.f32.mxu1 %vm267_vm1, %v6292_v35  ;;  %5078 = vmatprep.mubr.msk.f32.mxu0 %vm267_vm1, %v6199_v29 }
  0x9d   : > { %4853 = vmatmul.mubr.msk.f32.gmra.mrb[30].mxu1 %vm267_vm1, %v6303_v62  ;;  %5079 = vmatmul.mubr.msk.f32.gmra.mrb[14].mxu0 %vm267_vm1, %v6215_v31 }
  0x9e   : > { %4857 = vmatprep.mubr.msk.f32.mxu1 %vm267_vm1, %v917_v3  ;;  %5081 = vmatprep.mubr.msk.f32.mxu0 %vm267_vm1, %v6220_v0  ;;  %v6889_v3 = vld [vmem:[#allocation28_spill] sm:$0xff] }
  0xa1   : > { %4858 = vmatmul.mubr.msk.f32.vlgmr.msra.gmra.mrb[0].mxu1 %vm267_vm1, %v918_v33  ;;  %5082 = vmatmul.mubr.msk.f32.gmra.mrb[16].mxu0 %vm267_vm1, %v6233_v28  ;;  %v4282_v33 = vld [vmem:[%s5744_s11 + $0x198] sm:$0xff] }
  0xa2   : > { %4906 = vmatpush3.msk.msra.mxu1 %vm364_vm0, %v6045_v61  ;;  %4860 = vmatprep.mubr.msk.f32.mxu1 %vm267_vm1, %v5860_v24  ;;  %v6358_v24 = vld [vmem:[%s5744_s11 + $0x180] sm:$0xff] }
  0xa3   : > { %5084 = vmatprep.mubr.msk.f32.mxu0 %vm267_vm1, %v6236_v5  ;;  %5205 = vmatprep.subr.msk.mxu1 %vm364_vm0, %v5723_v1  ;;  %v4283_v61 = vld [vmem:[%s5744_s11 + $0x1a0] sm:$0xff] }
  0xa5   : > { %4861 = vmatmul.mubr.msk.f32.gmra.mrb[2].mxu1 %vm267_vm1, %v5871_v25  ;;  %5085 = vmatmul.mubr.msk.f32.gmra.mrb[18].mxu0 %vm267_vm1, %v6247_v7  ;;  %v6369_v25 = vld [vmem:[%s5744_s11 + $0x188] sm:$0xff] }
  0xa6   : > { %4863 = vmatprep.mubr.msk.f32.mxu1 %vm267_vm1, %v5877_v27  ;;  %5087 = vmatprep.mubr.msk.f32.mxu0 %vm267_vm1, %v6250_v10 }
  0xa9   : > { %4864 = vmatmul.mubr.msk.f32.gmra.mrb[4].mxu1 %vm267_vm1, %v5895_v30  ;;  %5088 = vmatmul.mubr.msk.f32.gmra.mrb[20].mxu0 %vm267_vm1, %v6261_v57 }
  0xaa   : > { %4866 = vmatprep.mubr.msk.f32.mxu1 %vm267_vm1, %v5903_v32  ;;  %5090 = vmatprep.mubr.msk.f32.mxu0 %vm267_vm1, %v6264_v51 }
  0xad   : > { %4867 = vmatmul.mubr.msk.f32.gmra.mrb[6].mxu1 %vm267_vm1, %v5919_v34  ;;  %5091 = vmatmul.mubr.msk.f32.gmra.mrb[22].mxu0 %vm267_vm1, %v6275_v47 }
  0xae   : > { %4869 = vmatprep.mubr.msk.f32.mxu1 %vm267_vm1, %v5925_v36  ;;  %5093 = vmatprep.mubr.msk.f32.mxu0 %vm267_vm1, %v6278_v43 }
  0xb1   : > { %4870 = vmatmul.mubr.msk.f32.gmra.mrb[8].mxu1 %vm267_vm1, %v5939_v38  ;;  %5094 = vmatmul.mubr.msk.f32.gmra.mrb[24].mxu0 %vm267_vm1, %v6289_v39 }
  0xb2   : > { %4872 = vmatprep.mubr.msk.f32.mxu1 %vm267_vm1, %v5945_v40  ;;  %5096 = vmatprep.mubr.msk.f32.mxu0 %vm267_vm1, %v6292_v35 }
  0xb5   : > { %4873 = vmatmul.mubr.msk.f32.gmra.mrb[10].mxu1 %vm267_vm1, %v5959_v42  ;;  %5097 = vmatmul.mubr.msk.f32.gmra.mrb[26].mxu0 %vm267_vm1, %v6303_v62 }
  0xb6   : > { %4875 = vmatprep.mubr.msk.f32.mxu1 %vm267_vm1, %v5965_v44  ;;  %5099 = vmatprep.mubr.msk.f32.mxu0 %vm267_vm1, %v6358_v24 }
  0xb9   : > { %4876 = vmatmul.mubr.msk.f32.gmra.mrb[12].mxu1 %vm267_vm1, %v5979_v46  ;;  %5100 = vmatmul.mubr.msk.f32.gmra.mrb[28].mxu0 %vm267_vm1, %v6369_v25 }
  0xba   : > { %4878 = vmatprep.mubr.msk.f32.mxu1 %vm267_vm1, %v5985_v48  ;;  %5102 = vmatprep.mubr.msk.f32.mxu0 %vm267_vm1, %v4282_v33  ;;  %v6890_v33 = vld [vmem:[#allocation16_spill] sm:$0xff] }
  0xbd   : > { %4879 = vmatmul.mubr.msk.f32.gmra.mrb[14].mxu1 %vm267_vm1, %v5999_v50  ;;  %5103 = vmatmul.mubr.msk.f32.gmra.mrb[30].mxu0 %vm267_vm1, %v4283_v61  ;;  %v6891_v61 = vld [vmem:[#allocation29_spill] sm:$0xff] }
  0xbe   : > { %4881 = vmatprep.mubr.msk.f32.mxu1 %vm267_vm1, %v6005_v52  ;;  %5107 = vmatprep.mubr.msk.f32.mxu0 %vm267_vm1, %v5753_v8  ;;  %v6873_v8 = vld [vmem:[#allocation33_spill] sm:$0xff] }
  0xc1   : > { %4882 = vmatmul.mubr.msk.f32.gmra.mrb[16].mxu1 %vm267_vm1, %v6019_v54  ;;  %5108 = vmatmul.mubr.msk.f32.vlgmr.msra.gmra.mrb[0].mxu0 %vm267_vm1, %v5768_v11  ;;  %v6874_v11 = vld [vmem:[#allocation8_spill] sm:$0xff] }
  0xc2   : > { %5156 = vmatpush3.msk.msra.mxu0 %vm364_vm0, %v6204_v37  ;;  %4884 = vmatprep.mubr.msk.f32.mxu1 %vm267_vm1, %v6023_v56  ;;  %v6888_v37 = vld [vmem:[#allocation15_spill] sm:$0xff] }
  0xc3   : > { %5110 = vmatprep.mubr.msk.f32.mxu0 %vm267_vm1, %v5774_v12  ;;  %v6875_v12 = vld [vmem:[#allocation21_spill] sm:$0xff] }
  0xc5   : > { %4885 = vmatmul.mubr.msk.f32.gmra.mrb[18].mxu1 %vm267_vm1, %v6034_v58  ;;  %5111 = vmatmul.mubr.msk.f32.gmra.mrb[2].mxu0 %vm267_vm1, %v5787_v13  ;;  %v6876_v13 = vld [vmem:[#allocation9_spill] sm:$0xff] }
  0xc6   : > { %4887 = vmatprep.mubr.msk.f32.mxu1 %vm267_vm1, %v6040_v60  ;;  %5113 = vmatprep.mubr.msk.f32.mxu0 %vm267_vm1, %v5790_v14  ;;  %v6877_v14 = vld [vmem:[#allocation22_spill] sm:$0xff] }
  0xc9   : > { %4888 = vmatmul.mubr.msk.f32.gmra.mrb[20].mxu1 %vm267_vm1, %v6058_v63  ;;  %5114 = vmatmul.mubr.msk.f32.gmra.mrb[4].mxu0 %vm267_vm1, %v5801_v15  ;;  %v6878_v15 = vld [vmem:[#allocation10_spill] sm:$0xff] }
  0xca   : > { %4890 = vmatprep.mubr.msk.f32.mxu1 %vm267_vm1, %v6066_v2  ;;  %5116 = vmatprep.mubr.msk.f32.mxu0 %vm267_vm1, %v5804_v16  ;;  %v6879_v16 = vld [vmem:[#allocation23_spill] sm:$0xff] }
  0xcd   : > { %4891 = vmatmul.mubr.msk.f32.gmra.mrb[22].mxu1 %vm267_vm1, %v6082_v4  ;;  %5117 = vmatmul.mubr.msk.f32.gmra.mrb[6].mxu0 %vm267_vm1, %v5815_v17  ;;  %v6880_v17 = vld [vmem:[#allocation11_spill] sm:$0xff] }
  0xce   : > { %4893 = vmatprep.mubr.msk.f32.mxu1 %vm267_vm1, %v6088_v6  ;;  %5119 = vmatprep.mubr.msk.f32.mxu0 %vm267_vm1, %v5818_v18  ;;  %v6881_v18 = vld [vmem:[#allocation24_spill] sm:$0xff] }
  0xd1   : > { %4894 = vmatmul.mubr.msk.f32.gmra.mrb[24].mxu1 %vm267_vm1, %v6102_v9  ;;  %5120 = vmatmul.mubr.msk.f32.gmra.mrb[8].mxu0 %vm267_vm1, %v5829_v19  ;;  %v6882_v19 = vld [vmem:[#allocation12_spill] sm:$0xff] }
  0xd2   : > { %4896 = vmatprep.mubr.msk.f32.mxu1 %vm267_vm1, %v6108_v55  ;;  %5122 = vmatprep.mubr.msk.f32.mxu0 %vm267_vm1, %v5832_v20  ;;  %v6883_v20 = vld [vmem:[#allocation25_spill] sm:$0xff] }
  0xd5   : > { %4897 = vmatmul.mubr.msk.f32.gmra.mrb[26].mxu1 %vm267_vm1, %v6122_v53  ;;  %5123 = vmatmul.mubr.msk.f32.gmra.mrb[10].mxu0 %vm267_vm1, %v5843_v21  ;;  %v6884_v21 = vld [vmem:[#allocation13_spill] sm:$0xff] }
  0xd6   : > { %4899 = vmatprep.mubr.msk.f32.mxu1 %vm267_vm1, %v6128_v49  ;;  %5125 = vmatprep.mubr.msk.f32.mxu0 %vm267_vm1, %v5846_v22  ;;  %v6886_v22 = vld [vmem:[#allocation14_spill] sm:$0xff] }
  0xd9   : > { %4900 = vmatmul.mubr.msk.f32.gmra.mrb[28].mxu1 %vm267_vm1, %v6142_v45  ;;  %5126 = vmatmul.mubr.msk.f32.gmra.mrb[12].mxu0 %vm267_vm1, %v5857_v23  ;;  %v6887_v23 = vld [vmem:[#allocation27_spill] sm:$0xff] }
  0xda   : > { %4902 = vmatprep.mubr.msk.f32.mxu1 %vm267_vm1, %v6148_v41  ;;  %5128 = vmatprep.mubr.msk.f32.mxu0 %vm267_vm1, %v5874_v26 }
  0xdd   : > { %4903 = vmatmul.mubr.msk.f32.gmra.mrb[30].mxu1 %vm267_vm1, %v6873_v8  ;;  %5129 = vmatmul.mubr.msk.f32.gmra.mrb[14].mxu0 %vm267_vm1, %v6874_v11  ;;  %v6900_v8 = vld [vmem:[#allocation36_spill] sm:$0xff] }
  0xde   : > { %4907 = vmatprep.mubr.msk.f32.mxu1 %vm267_vm1, %v6875_v12  ;;  %5131 = vmatprep.mubr.msk.f32.mxu0 %vm267_vm1, %v6876_v13  ;;  %v6892_v12 = vld [vmem:[#allocation17_spill] sm:$0xff] }
  0xe1   : > { %4908 = vmatmul.mubr.msk.f32.vlgmr.msra.gmra.mrb[0].mxu1 %vm267_vm1, %v6877_v14  ;;  %5132 = vmatmul.mubr.msk.f32.gmra.mrb[16].mxu0 %vm267_vm1, %v6878_v15  ;;  %v6893_v14 = vld [vmem:[#allocation30_spill] sm:$0xff] }
  0xe2   : > { %5206 = vmatpush3.msk.msra.mxu1 %vm364_vm0, %v5723_v1  ;;  %4910 = vmatprep.mubr.msk.f32.mxu1 %vm267_vm1, %v6879_v16  ;;  %v6885_v1 = vld [vmem:[#allocation26_spill] sm:$0xff] }
  0xe3   : > { %5134 = vmatprep.mubr.msk.f32.mxu0 %vm267_vm1, %v6880_v17  ;;  %v6894_v16 = vld [vmem:[#allocation18_spill] sm:$0xff] }
  0xe5   : > { %4911 = vmatmul.mubr.msk.f32.gmra.mrb[2].mxu1 %vm267_vm1, %v6881_v18  ;;  %5135 = vmatmul.mubr.msk.f32.gmra.mrb[18].mxu0 %vm267_vm1, %v6882_v19  ;;  %v6895_v18 = vld [vmem:[#allocation31_spill] sm:$0xff] }
  0xe6   : > { %4913 = vmatprep.mubr.msk.f32.mxu1 %vm267_vm1, %v6883_v20  ;;  %5137 = vmatprep.mubr.msk.f32.mxu0 %vm267_vm1, %v6884_v21  ;;  %v6896_v20 = vld [vmem:[#allocation19_spill] sm:$0xff] }
  0xe9   : > { %4914 = vmatmul.mubr.msk.f32.gmra.mrb[4].mxu1 %vm267_vm1, %v6885_v1  ;;  %5138 = vmatmul.mubr.msk.f32.gmra.mrb[20].mxu0 %vm267_vm1, %v6886_v22  ;;  %v6496_v1 = vld [vmem:[%s5744_s11 + $0x181] sm:$0xff] }
  0xea   : > { %4916 = vmatprep.mubr.msk.f32.mxu1 %vm267_vm1, %v6887_v23  ;;  %5140 = vmatprep.mubr.msk.f32.mxu0 %vm267_vm1, %v6888_v37  ;;  %v6897_v23 = vld [vmem:[#allocation32_spill] sm:$0xff] }
  0xed   : > { %4917 = vmatmul.mubr.msk.f32.gmra.mrb[6].mxu1 %vm267_vm1, %v6889_v3  ;;  %5141 = vmatmul.mubr.msk.f32.gmra.mrb[22].mxu0 %vm267_vm1, %v6890_v33  ;;  %v6898_v3 = vld [vmem:[#allocation20_spill] sm:$0xff] }
  0xee   : > { %4919 = vmatprep.mubr.msk.f32.mxu1 %vm267_vm1, %v6891_v61  ;;  %5143 = vmatprep.mubr.msk.f32.mxu0 %vm267_vm1, %v6892_v12  ;;  %v6899_v61 = vld [vmem:[#allocation34_spill] sm:$0xff] }
  0xf1   : > { %4920 = vmatmul.mubr.msk.f32.gmra.mrb[8].mxu1 %vm267_vm1, %v6893_v14  ;;  %5144 = vmatmul.mubr.msk.f32.gmra.mrb[24].mxu0 %vm267_vm1, %v6894_v16  ;;  %v6507_v14 = vld [vmem:[%s5744_s11 + $0x189] sm:$0xff] }
  0xf2   : > { %4922 = vmatprep.mubr.msk.f32.mxu1 %vm267_vm1, %v6895_v18  ;;  %5146 = vmatprep.mubr.msk.f32.mxu0 %vm267_vm1, %v6896_v20  ;;  %v4348_v18 = vld [vmem:[%s5744_s11 + $0x199] sm:$0xff] }
  0xf5   : > { %4923 = vmatmul.mubr.msk.f32.gmra.mrb[10].mxu1 %vm267_vm1, %v6897_v23  ;;  %5147 = vmatmul.mubr.msk.f32.gmra.mrb[26].mxu0 %vm267_vm1, %v6898_v3  ;;  %v4349_v23 = vld [vmem:[%s5744_s11 + $0x1a1] sm:$0xff]  ;;  %v6901_v3 = vld [vmem:[#allocation38_spill] sm:$0xff] }
  0xf6   : > { %4925 = vmatprep.mubr.msk.f32.mxu1 %vm267_vm1, %v6899_v61  ;;  %5149 = vmatprep.mubr.msk.f32.mxu0 %vm267_vm1, %v6496_v1 }
  0xf9   : > { %4926 = vmatmul.mubr.msk.f32.gmra.mrb[12].mxu1 %vm267_vm1, %v6900_v8  ;;  %5150 = vmatmul.mubr.msk.f32.gmra.mrb[28].mxu0 %vm267_vm1, %v6507_v14 }
  0xfa   : > { %4928 = vmatprep.mubr.msk.f32.mxu1 %vm267_vm1, %v6185_v59  ;;  %5152 = vmatprep.mubr.msk.f32.mxu0 %vm267_vm1, %v4348_v18 }
  0xfd   : > { %4929 = vmatmul.mubr.msk.f32.gmra.mrb[14].mxu1 %vm267_vm1, %v6901_v3  ;;  %5153 = vmatmul.mubr.msk.f32.gmra.mrb[30].mxu0 %vm267_vm1, %v4349_v23 }
  0xfe   : > { %4931 = vmatprep.mubr.msk.f32.mxu1 %vm267_vm1, %v6199_v29  ;;  %5157 = vmatprep.mubr.msk.f32.mxu0 %vm267_vm1, %v5877_v27  ;;  %v6903_v27 = vld [vmem:[#allocation35_spill] sm:$0xff] }
  0xff   : > { %v4414_v29 = vld [vmem:[%s5744_s11 + $0x19a] sm:$0xff] }
 0x101   : > { %4932 = vmatmul.mubr.msk.f32.gmra.mrb[16].mxu1 %vm267_vm1, %v6215_v31  ;;  %5158 = vmatmul.mubr.msk.f32.vlgmr.msra.gmra.mrb[0].mxu0 %vm267_vm1, %v5895_v30  ;;  %v6904_v30 = vld [vmem:[#allocation20_spill] sm:$0xff]  ;;  %v6905_v31 = vld [vmem:[#allocation37_spill] sm:$0xff] }
 0x102   : > { %4934 = vmatprep.mubr.msk.f32.mxu1 %vm267_vm1, %v6220_v0  ;;  %5160 = vmatprep.mubr.msk.f32.mxu0 %vm267_vm1, %v5903_v32  ;;  %v4415_v32 = vld [vmem:[%s5744_s11 + $0x1a2] sm:$0xff] }
 0x105   : > { %4935 = vmatmul.mubr.msk.f32.gmra.mrb[18].mxu1 %vm267_vm1, %v6233_v28  ;;  %5161 = vmatmul.mubr.msk.f32.gmra.mrb[2].mxu0 %vm267_vm1, %v5919_v34 }
 0x106   : > { %4937 = vmatprep.mubr.msk.f32.mxu1 %vm267_vm1, %v6236_v5  ;;  %5163 = vmatprep.mubr.msk.f32.mxu0 %vm267_vm1, %v5925_v36 }
 0x109   : > { %4938 = vmatmul.mubr.msk.f32.gmra.mrb[20].mxu1 %vm267_vm1, %v6247_v7  ;;  %5164 = vmatmul.mubr.msk.f32.gmra.mrb[4].mxu0 %vm267_vm1, %v5939_v38 }
 0x10a   : > { %4940 = vmatprep.mubr.msk.f32.mxu1 %vm267_vm1, %v6250_v10  ;;  %5166 = vmatprep.mubr.msk.f32.mxu0 %vm267_vm1, %v5945_v40 }
 0x10d   : > { %4941 = vmatmul.mubr.msk.f32.gmra.mrb[22].mxu1 %vm267_vm1, %v6261_v57  ;;  %5167 = vmatmul.mubr.msk.f32.gmra.mrb[6].mxu0 %vm267_vm1, %v5959_v42 }
 0x10e   : > { %4943 = vmatprep.mubr.msk.f32.mxu1 %vm267_vm1, %v6264_v51  ;;  %5169 = vmatprep.mubr.msk.f32.mxu0 %vm267_vm1, %v5965_v44 }
 0x111   : > { %4944 = vmatmul.mubr.msk.f32.gmra.mrb[24].mxu1 %vm267_vm1, %v6275_v47  ;;  %5170 = vmatmul.mubr.msk.f32.gmra.mrb[8].mxu0 %vm267_vm1, %v5979_v46 }
 0x112   : > { %4946 = vmatprep.mubr.msk.f32.mxu1 %vm267_vm1, %v6278_v43  ;;  %5172 = vmatprep.mubr.msk.f32.mxu0 %vm267_vm1, %v5985_v48 }
 0x115   : > { %4947 = vmatmul.mubr.msk.f32.gmra.mrb[26].mxu1 %vm267_vm1, %v6289_v39  ;;  %5173 = vmatmul.mubr.msk.f32.gmra.mrb[10].mxu0 %vm267_vm1, %v5999_v50 }
 0x116   : > { %4949 = vmatprep.mubr.msk.f32.mxu1 %vm267_vm1, %v6292_v35  ;;  %5175 = vmatprep.mubr.msk.f32.mxu0 %vm267_vm1, %v6005_v52 }
 0x119   : > { %4950 = vmatmul.mubr.msk.f32.gmra.mrb[28].mxu1 %vm267_vm1, %v6303_v62  ;;  %5176 = vmatmul.mubr.msk.f32.gmra.mrb[12].mxu0 %vm267_vm1, %v6019_v54 }
 0x11a   : > { %4952 = vmatprep.mubr.msk.f32.mxu1 %vm267_vm1, %v6358_v24  ;;  %5178 = vmatprep.mubr.msk.f32.mxu0 %vm267_vm1, %v6023_v56 }
 0x11d   : > { %4953 = vmatmul.mubr.msk.f32.gmra.mrb[30].mxu1 %vm267_vm1, %v6369_v25  ;;  %5179 = vmatmul.mubr.msk.f32.gmra.mrb[14].mxu0 %vm267_vm1, %v6034_v58 }
 0x11e   : > { %4981 = vmatprep.mubr.msk.f32.mxu1 %vm267_vm1, %v5874_v26  ;;  %5181 = vmatprep.mubr.msk.f32.mxu0 %vm267_vm1, %v6040_v60  ;;  %v6902_v26 = vld [vmem:[#allocation33_spill] sm:$0xff] }
 0x121   : > { %4982 = vmatmul.mubr.msk.f32.vlgmr.msra.gmra.mrb[16].mxu1 %vm267_vm1, %v6874_v11  ;;  %5182 = vmatmul.mubr.msk.f32.gmra.mrb[16].mxu0 %vm267_vm1, %v6058_v63 }
 0x122   : > { %4984 = vmatprep.mubr.msk.f32.mxu1 %vm267_vm1, %v6876_v13  ;;  %5184 = vmatprep.mubr.msk.f32.mxu0 %vm267_vm1, %v6066_v2 }
 0x125   : > { %4985 = vmatmul.mubr.msk.f32.gmra.mrb[18].mxu1 %vm267_vm1, %v6878_v15  ;;  %5185 = vmatmul.mubr.msk.f32.gmra.mrb[18].mxu0 %vm267_vm1, %v6082_v4 }
 0x126   : > { %4987 = vmatprep.mubr.msk.f32.mxu1 %vm267_vm1, %v6880_v17  ;;  %5187 = vmatprep.mubr.msk.f32.mxu0 %vm267_vm1, %v6088_v6 }
 0x129   : > { %4988 = vmatmul.mubr.msk.f32.gmra.mrb[20].mxu1 %vm267_vm1, %v6882_v19  ;;  %5188 = vmatmul.mubr.msk.f32.gmra.mrb[20].mxu0 %vm267_vm1, %v6102_v9 }
 0x12a   : > { %4990 = vmatprep.mubr.msk.f32.mxu1 %vm267_vm1, %v6884_v21  ;;  %5190 = vmatprep.mubr.msk.f32.mxu0 %vm267_vm1, %v6108_v55 }
 0x12d   : > { %4991 = vmatmul.mubr.msk.f32.gmra.mrb[22].mxu1 %vm267_vm1, %v6886_v22  ;;  %5191 = vmatmul.mubr.msk.f32.gmra.mrb[22].mxu0 %vm267_vm1, %v6122_v53 }
 0x12e   : > { %4993 = vmatprep.mubr.msk.f32.mxu1 %vm267_vm1, %v6888_v37  ;;  %5193 = vmatprep.mubr.msk.f32.mxu0 %vm267_vm1, %v6128_v49 }
 0x131   : > { %4994 = vmatmul.mubr.msk.f32.gmra.mrb[24].mxu1 %vm267_vm1, %v6890_v33  ;;  %5194 = vmatmul.mubr.msk.f32.gmra.mrb[24].mxu0 %vm267_vm1, %v6142_v45 }
 0x132   : > { %4996 = vmatprep.mubr.msk.f32.mxu1 %vm267_vm1, %v6892_v12  ;;  %5196 = vmatprep.mubr.msk.f32.mxu0 %vm267_vm1, %v6148_v41 }
 0x135   : > { %4997 = vmatmul.mubr.msk.f32.gmra.mrb[26].mxu1 %vm267_vm1, %v6894_v16  ;;  %5197 = vmatmul.mubr.msk.f32.gmra.mrb[26].mxu0 %vm267_vm1, %v6902_v26 }
 0x136   : > { %4999 = vmatprep.mubr.msk.f32.mxu1 %vm267_vm1, %v6896_v20  ;;  %5199 = vmatprep.mubr.msk.f32.mxu0 %vm267_vm1, %v6903_v27 }
 0x139   : > { %5000 = vmatmul.mubr.msk.f32.gmra.mrb[28].mxu1 %vm267_vm1, %v6904_v30  ;;  %5200 = vmatmul.mubr.msk.f32.gmra.mrb[28].mxu0 %vm267_vm1, %v6905_v31 }
 0x13a   : > { %5002 = vmatprep.mubr.msk.f32.mxu1 %vm267_vm1, %v6496_v1  ;;  %5202 = vmatprep.mubr.msk.f32.mxu0 %vm267_vm1, %v4414_v29 }
 0x13d   : > { %5003 = vmatmul.mubr.msk.f32.gmra.mrb[30].mxu1 %vm267_vm1, %v6507_v14  ;;  %5203 = vmatmul.mubr.msk.f32.gmra.mrb[30].mxu0 %vm267_vm1, %v4415_v32 }
 0x1b4   : > { %v4909_v34 = vpop.f32.mrb[0].mxu1 }
 0x1b5   : > { %v1509_v35 = vpop.f32.mrb[1].mxu1 }
 0x1b8   : > { %v4912_v36 = vpop.f32.mrb[2].mxu1 }
 0x1b9   : > { %v1519_v38 = vpop.f32.mrb[3].mxu1 }
 0x1bc   : > { %v4915_v39 = vpop.f32.mrb[4].mxu1 }
 0x1bd   : > { %v1529_v40 = vpop.f32.mrb[5].mxu1 }
 0x1c0   : > { %v4918_v41 = vpop.f32.mrb[6].mxu1 }
 0x1c1   : > { %v1539_v42 = vpop.f32.mrb[7].mxu1 }
 0x1c4   : > { %v4921_v43 = vpop.f32.mrb[8].mxu1 }
 0x1c5   : > { %v1549_v44 = vpop.f32.mrb[9].mxu1 }
 0x1c8   : > { %v6649_v45 = vpop.f32.mrb[10].mxu1 }
 0x1c9   : > { %v6651_v46 = vpop.f32.mrb[11].mxu1 }
 0x1cc   : > { %v6653_v47 = vpop.f32.mrb[12].mxu1 }
 0x1cd   : > { %v6655_v48 = vpop.f32.mrb[13].mxu1 }
 0x1d0   : > { %v6660_v49 = vpop.f32.mrb[14].mxu1 }
 0x1d1   : > { %v6662_v50 = vpop.f32.mrb[15].mxu1 }
 0x1d4   : > { %v5159_v51 = vpop.f32.mrb[0].mxu0 }
 0x1d5   : > { %v5207_v52 = vadd.f32 %v5159_v51, %v4909_v34  ;;  %v3462_v53 = vpop.f32.mrb[1].mxu0 }
 0x1d6   : > { %v5208_v54 = vadd.f32 %v3462_v53, %v1509_v35 }
 0x1d7   : > { %3654 = vst [vmem:[%s6665_s7 + $0x8] sm:$0xff] %v5207_v52  ;;  %v3723_v56 = vmul.f32 %v5207_v52, %v5207_v52 }
 0x1d8   : > { %3653 = vst [vmem:[%s6665_s7] sm:$0xff] %v5208_v54  ;;  %v3685_v58 = vadd.f32 %v5208_v54, %v5207_v52  ;;  %v3722_v59 = vmul.f32 %v5208_v54, %v5208_v54  ;;  %v5162_v60 = vpop.f32.mrb[2].mxu0 }
 0x1d9   : > { %v5209_v62 = vadd.f32 %v5162_v60, %v4912_v36  ;;  %v3472_v63 = vpop.f32.mrb[3].mxu0 }
 0x1da   : > { %v3754_v0 = vadd.f32 %v3723_v56, %v3722_v59  ;;  %v5210_v2 = vadd.f32 %v3472_v63, %v1519_v38 }
 0x1db   : > { %3656 = vst [vmem:[%s6665_s7 + $0x18] sm:$0xff] %v5209_v62  ;;  %v3725_v10 = vmul.f32 %v5209_v62, %v5209_v62 }
 0x1dc   : > { %3655 = vst [vmem:[%s6665_s7 + $0x10] sm:$0xff] %v5210_v2  ;;  %v3686_v4 = vadd.f32 %v5210_v2, %v3685_v58  ;;  %v3724_v5 = vmul.f32 %v5210_v2, %v5210_v2  ;;  %v5165_v6 = vpop.f32.mrb[4].mxu0 }
 0x1dd   : > { %v5211_v7 = vadd.f32 %v5165_v6, %v4915_v39  ;;  %v3482_v9 = vpop.f32.mrb[5].mxu0 }
 0x1de   : > { %v3755_v55 = vadd.f32 %v3754_v0, %v3724_v5  ;;  %v5212_v57 = vadd.f32 %v3482_v9, %v1529_v40  ;;  %v3687_v28 = vadd.f32 %v5209_v62, %v3686_v4 }
 0x1df   : > { %3658 = vst [vmem:[%s6665_s7 + $0x28] sm:$0xff] %v5211_v7  ;;  %v3727_v17 = vmul.f32 %v5211_v7, %v5211_v7 }
 0x1e0   : > { %3657 = vst [vmem:[%s6665_s7 + $0x20] sm:$0xff] %v5212_v57  ;;  %v3688_v24 = vadd.f32 %v5212_v57, %v3687_v28  ;;  %v3726_v25 = vmul.f32 %v5212_v57, %v5212_v57  ;;  %v3756_v8 = vadd.f32 %v3755_v55, %v3725_v10  ;;  %v5168_v11 = vpop.f32.mrb[6].mxu0 }
 0x1e1   : > { %v5213_v13 = vadd.f32 %v5168_v11, %v4918_v41  ;;  %v3492_v15 = vpop.f32.mrb[7].mxu0 }
 0x1e2   : > { %v3757_v19 = vadd.f32 %v3756_v8, %v3726_v25  ;;  %v5214_v21 = vadd.f32 %v3492_v15, %v1539_v42  ;;  %v3689_v22 = vadd.f32 %v5211_v7, %v3688_v24 }
 0x1e3   : > { %3660 = vst [vmem:[%s6665_s7 + $0x38] sm:$0xff] %v5213_v13  ;;  %v3729_v3 = vmul.f32 %v5213_v13, %v5213_v13 }
 0x1e4   : > { %3659 = vst [vmem:[%s6665_s7 + $0x30] sm:$0xff] %v5214_v21  ;;  %v3690_v37 = vadd.f32 %v5214_v21, %v3689_v22  ;;  %v3728_v33 = vmul.f32 %v5214_v21, %v5214_v21  ;;  %v3758_v12 = vadd.f32 %v3757_v19, %v3727_v17  ;;  %v5171_v16 = vpop.f32.mrb[8].mxu0 }
 0x1e5   : > { %v5215_v20 = vadd.f32 %v5171_v16, %v4921_v43  ;;  %v3502_v1 = vpop.f32.mrb[9].mxu0 }
 0x1e6   : > { %v3759_v61 = vadd.f32 %v3758_v12, %v3728_v33  ;;  %v5216_v14 = vadd.f32 %v3502_v1, %v1549_v44  ;;  %v3691_v18 = vadd.f32 %v5213_v13, %v3690_v37 }
 0x1e7   : > { %3662 = vst [vmem:[%s6665_s7 + $0x48] sm:$0xff] %v5215_v20  ;;  %v3731_v32 = vmul.f32 %v5215_v20, %v5215_v20 }
 0x1e8   : > { %3661 = vst [vmem:[%s6665_s7 + $0x40] sm:$0xff] %v5216_v14  ;;  %v3692_v23 = vadd.f32 %v5216_v14, %v3691_v18  ;;  %v3730_v26 = vmul.f32 %v5216_v14, %v5216_v14  ;;  %v3760_v27 = vadd.f32 %v3759_v61, %v3729_v3  ;;  %v5174_v29 = vpop.f32.mrb[10].mxu0 }
 0x1e9   : > { %v5217_v30 = vadd.f32 %v5174_v29, %v6649_v45  ;;  %v3512_v31 = vpop.f32.mrb[11].mxu0 }
 0x1ea   : > { %v3761_v34 = vadd.f32 %v3760_v27, %v3730_v26  ;;  %v5218_v35 = vadd.f32 %v3512_v31, %v6651_v46  ;;  %v3693_v36 = vadd.f32 %v5215_v20, %v3692_v23 }
 0x1eb   : > { %3664 = vst [vmem:[%s6665_s7 + $0x58] sm:$0xff] %v5217_v30  ;;  %v3733_v44 = vmul.f32 %v5217_v30, %v5217_v30 }
 0x1ec   : > { %3663 = vst [vmem:[%s6665_s7 + $0x50] sm:$0xff] %v5218_v35  ;;  %v3694_v38 = vadd.f32 %v5218_v35, %v3693_v36  ;;  %v3732_v39 = vmul.f32 %v5218_v35, %v5218_v35  ;;  %v3762_v40 = vadd.f32 %v3761_v34, %v3731_v32  ;;  %v5177_v41 = vpop.f32.mrb[12].mxu0 }
 0x1ed   : > { %v5219_v42 = vadd.f32 %v5177_v41, %v6653_v47  ;;  %v3522_v43 = vpop.f32.mrb[13].mxu0 }
 0x1ee   : > { %v3763_v45 = vadd.f32 %v3762_v40, %v3732_v39  ;;  %v5220_v51 = vadd.f32 %v3522_v43, %v6655_v48  ;;  %v3695_v52 = vadd.f32 %v5217_v30, %v3694_v38 }
 0x1ef   : > { %3666 = vst [vmem:[%s6665_s7 + $0x68] sm:$0xff] %v5219_v42  ;;  %v3735_v60 = vmul.f32 %v5219_v42, %v5219_v42 }
 0x1f0   : > { %3665 = vst [vmem:[%s6665_s7 + $0x60] sm:$0xff] %v5220_v51  ;;  %v3696_v46 = vadd.f32 %v5220_v51, %v3695_v52  ;;  %v3734_v53 = vmul.f32 %v5220_v51, %v5220_v51  ;;  %v3764_v54 = vadd.f32 %v3763_v45, %v3733_v44  ;;  %v5180_v56 = vpop.f32.mrb[14].mxu0 }
 0x1f1   : > { %v5221_v58 = vadd.f32 %v5180_v56, %v6660_v49  ;;  %v3532_v59 = vpop.f32.mrb[15].mxu0 }
 0x1f2   : > { %v3765_v62 = vadd.f32 %v3764_v54, %v3734_v53  ;;  %v5222_v47 = vadd.f32 %v3532_v59, %v6662_v50  ;;  %v3697_v63 = vadd.f32 %v5219_v42, %v3696_v46 }
 0x1f3   : > { %3668 = vst [vmem:[%s6665_s7 + $0x78] sm:$0xff] %v5221_v58  ;;  %v3737_v10 = vmul.f32 %v5221_v58, %v5221_v58 }
 0x1f4   : > { %3667 = vst [vmem:[%s6665_s7 + $0x70] sm:$0xff] %v5222_v47  ;;  %v3698_v48 = vadd.f32 %v5222_v47, %v3697_v63  ;;  %v3736_v0 = vmul.f32 %v5222_v47, %v5222_v47  ;;  %v3766_v2 = vadd.f32 %v3765_v62, %v3735_v60  ;;  %v4983_v4 = vpop.f32.mrb[16].mxu1  ;;  %v5183_v5 = vpop.f32.mrb[16].mxu0 }
 0x1f5   : > { %v5223_v6 = vadd.f32 %v5183_v5, %v4983_v4  ;;  %v1979_v7 = vpop.f32.mrb[17].mxu1  ;;  %v3542_v9 = vpop.f32.mrb[17].mxu0 }
 0x1f6   : > { %v3767_v49 = vadd.f32 %v3766_v2, %v3736_v0  ;;  %v5224_v55 = vadd.f32 %v3542_v9, %v1979_v7  ;;  %v3699_v57 = vadd.f32 %v5221_v58, %v3698_v48 }
 0x1f7   : > { %3670 = vst [vmem:[%s6665_s7 + $0x88] sm:$0xff] %v5223_v6  ;;  %v3739_v17 = vmul.f32 %v5223_v6, %v5223_v6 }
 0x1f8   : > { %3669 = vst [vmem:[%s6665_s7 + $0x80] sm:$0xff] %v5224_v55  ;;  %v3700_v50 = vadd.f32 %v5224_v55, %v3699_v57  ;;  %v3738_v28 = vmul.f32 %v5224_v55, %v5224_v55  ;;  %v3768_v24 = vadd.f32 %v3767_v49, %v3737_v10  ;;  %v4986_v25 = vpop.f32.mrb[18].mxu1  ;;  %v5186_v8 = vpop.f32.mrb[18].mxu0 }
 0x1f9   : > { %v5225_v11 = vadd.f32 %v5186_v8, %v4986_v25  ;;  %v1989_v13 = vpop.f32.mrb[19].mxu1  ;;  %v3552_v15 = vpop.f32.mrb[19].mxu0 }
 0x1fa   : > { %v3769_v19 = vadd.f32 %v3768_v24, %v3738_v28  ;;  %v5226_v21 = vadd.f32 %v3552_v15, %v1989_v13  ;;  %v3701_v22 = vadd.f32 %v5223_v6, %v3700_v50 }
 0x1fb   : > { %3672 = vst [vmem:[%s6665_s7 + $0x98] sm:$0xff] %v5225_v11  ;;  %v3741_v14 = vmul.f32 %v5225_v11, %v5225_v11 }
 0x1fc   : > { %3671 = vst [vmem:[%s6665_s7 + $0x90] sm:$0xff] %v5226_v21  ;;  %v3702_v37 = vadd.f32 %v5226_v21, %v3701_v22  ;;  %v3740_v33 = vmul.f32 %v5226_v21, %v5226_v21  ;;  %v3770_v12 = vadd.f32 %v3769_v19, %v3739_v17  ;;  %v4989_v16 = vpop.f32.mrb[20].mxu1  ;;  %v5189_v20 = vpop.f32.mrb[20].mxu0 }
 0x1fd   : > { %v5227_v1 = vadd.f32 %v5189_v20, %v4989_v16  ;;  %v1999_v3 = vpop.f32.mrb[21].mxu1  ;;  %v3562_v61 = vpop.f32.mrb[21].mxu0 }
 0x1fe   : > { %v3771_v18 = vadd.f32 %v3770_v12, %v3740_v33  ;;  %v5228_v23 = vadd.f32 %v3562_v61, %v1999_v3  ;;  %v3703_v26 = vadd.f32 %v5225_v11, %v3702_v37 }
 0x1ff   : > { %3674 = vst [vmem:[%s6665_s7 + $0xa8] sm:$0xff] %v5227_v1  ;;  %v3743_v38 = vmul.f32 %v5227_v1, %v5227_v1 }
 0x200   : > { %3673 = vst [vmem:[%s6665_s7 + $0xa0] sm:$0xff] %v5228_v23  ;;  %v3704_v27 = vadd.f32 %v5228_v23, %v3703_v26  ;;  %v3742_v29 = vmul.f32 %v5228_v23, %v5228_v23  ;;  %v3772_v30 = vadd.f32 %v3771_v18, %v3741_v14  ;;  %v4992_v31 = vpop.f32.mrb[22].mxu1  ;;  %v5192_v32 = vpop.f32.mrb[22].mxu0 }
 0x201   : > { %v5229_v34 = vadd.f32 %v5192_v32, %v4992_v31  ;;  %v2009_v35 = vpop.f32.mrb[23].mxu1  ;;  %v3572_v36 = vpop.f32.mrb[23].mxu0 }
 0x202   : > { %v3773_v39 = vadd.f32 %v3772_v30, %v3742_v29  ;;  %v5230_v40 = vadd.f32 %v3572_v36, %v2009_v35  ;;  %v3705_v41 = vadd.f32 %v5227_v1, %v3704_v27 }
 0x203   : > { %3676 = vst [vmem:[%s6665_s7 + $0xb8] sm:$0xff] %v5229_v34  ;;  %v3745_v54 = vmul.f32 %v5229_v34, %v5229_v34 }
 0x204   : > { %3675 = vst [vmem:[%s6665_s7 + $0xb0] sm:$0xff] %v5230_v40  ;;  %v3706_v42 = vadd.f32 %v5230_v40, %v3705_v41  ;;  %v3744_v43 = vmul.f32 %v5230_v40, %v5230_v40  ;;  %v3774_v44 = vadd.f32 %v3773_v39, %v3743_v38  ;;  %v4995_v45 = vpop.f32.mrb[24].mxu1  ;;  %v5195_v51 = vpop.f32.mrb[24].mxu0 }
 0x205   : > { %v5231_v52 = vadd.f32 %v5195_v51, %v4995_v45  ;;  %v2019_v46 = vpop.f32.mrb[25].mxu1  ;;  %v3582_v53 = vpop.f32.mrb[25].mxu0 }
 0x206   : > { %v3775_v56 = vadd.f32 %v3774_v44, %v3744_v43  ;;  %v5232_v58 = vadd.f32 %v3582_v53, %v2019_v46  ;;  %v3707_v59 = vadd.f32 %v5229_v34, %v3706_v42 }
 0x207   : > { %3678 = vst [vmem:[%s6665_s7 + $0xc8] sm:$0xff] %v5231_v52  ;;  %v3747_v5 = vmul.f32 %v5231_v52, %v5231_v52 }
 0x208   : > { %3677 = vst [vmem:[%s6665_s7 + $0xc0] sm:$0xff] %v5232_v58  ;;  %v3708_v60 = vadd.f32 %v5232_v58, %v3707_v59  ;;  %v3746_v62 = vmul.f32 %v5232_v58, %v5232_v58  ;;  %v3776_v47 = vadd.f32 %v3775_v56, %v3745_v54  ;;  %v4998_v63 = vpop.f32.mrb[26].mxu1  ;;  %v5198_v48 = vpop.f32.mrb[26].mxu0 }
 0x209   : > { %v5233_v0 = vadd.f32 %v5198_v48, %v4998_v63  ;;  %v2029_v2 = vpop.f32.mrb[27].mxu1  ;;  %v3592_v4 = vpop.f32.mrb[27].mxu0 }
 0x20a   : > { %v3777_v6 = vadd.f32 %v3776_v47, %v3746_v62  ;;  %v5234_v7 = vadd.f32 %v3592_v4, %v2029_v2  ;;  %v3709_v9 = vadd.f32 %v5231_v52, %v3708_v60 }
 0x20b   : > { %3680 = vst [vmem:[%s6665_s7 + $0xd8] sm:$0xff] %v5233_v0  ;;  %v3749_v8 = vmul.f32 %v5233_v0, %v5233_v0 }
 0x20c   : > { %3679 = vst [vmem:[%s6665_s7 + $0xd0] sm:$0xff] %v5234_v7  ;;  %v3710_v10 = vadd.f32 %v5234_v7, %v3709_v9  ;;  %v3748_v49 = vmul.f32 %v5234_v7, %v5234_v7  ;;  %v3778_v55 = vadd.f32 %v3777_v6, %v3747_v5  ;;  %v5001_v57 = vpop.f32.mrb[28].mxu1  ;;  %v5201_v50 = vpop.f32.mrb[28].mxu0 }
 0x20d   : > { %v5235_v28 = vadd.f32 %v5201_v50, %v5001_v57  ;;  %v2039_v24 = vpop.f32.mrb[29].mxu1  ;;  %v3602_v25 = vpop.f32.mrb[29].mxu0 }
 0x20e   : > { %v3779_v11 = vadd.f32 %v3778_v55, %v3748_v49  ;;  %v5236_v13 = vadd.f32 %v3602_v25, %v2039_v24  ;;  %v3711_v15 = vadd.f32 %v5233_v0, %v3710_v10 }
 0x20f   : > { %3682 = vst [vmem:[%s6665_s7 + $0xe8] sm:$0xff] %v5235_v28  ;;  %v3751_v20 = vmul.f32 %v5235_v28, %v5235_v28 }
 0x210   : > { %3681 = vst [vmem:[%s6665_s7 + $0xe0] sm:$0xff] %v5236_v13  ;;  %v3712_v17 = vadd.f32 %v5236_v13, %v3711_v15  ;;  %v3750_v19 = vmul.f32 %v5236_v13, %v5236_v13  ;;  %v3780_v21 = vadd.f32 %v3779_v11, %v3749_v8  ;;  %v5004_v22 = vpop.f32.mrb[30].mxu1  ;;  %v5204_v37 = vpop.f32.mrb[30].mxu0 }
 0x211   : > { %v5237_v33 = vadd.f32 %v5204_v37, %v5004_v22  ;;  %v2049_v12 = vpop.f32.mrb[31].mxu1  ;;  %v3612_v16 = vpop.f32.mrb[31].mxu0 }
 0x212   : > { %v3781_v1 = vadd.f32 %v3780_v21, %v3750_v19  ;;  %v5238_v3 = vadd.f32 %v3612_v16, %v2049_v12  ;;  %v3713_v61 = vadd.f32 %v5235_v28, %v3712_v17 }
 0x213   : > { %3684 = vst [vmem:[%s6665_s7 + $0xf8] sm:$0xff] %v5237_v33 }
 0x214   : > { %3683 = vst [vmem:[%s6665_s7 + $0xf0] sm:$0xff] %v5238_v3  ;;  %v3714_v14 = vadd.f32 %v5238_v3, %v3713_v61  ;;  %v3752_v18 = vmul.f32 %v5238_v3, %v5238_v3  ;;  %v3782_v23 = vadd.f32 %v3781_v1, %v3751_v20 }
 0x215   : > { %5539 = shalt.err (!%p5536_p5)
}
 0x216   : > { %s5540_s28 = scalar_lea.hbm %s6708_s18, 4096  ;;  %s5544_s4 = scalar_lea.hbm %s6793_s2, 8192 }
 0x217   : > { %p5541_p6 = scmp.ne.s32.totalorder %s6708_s18, %s5540_s28  ;;  %p5545_p10 = scmp.lt.u32.totalorder %s6708_s18, %s6793_s2 }
 0x218   : > { %p5546_p11 = scmp.lt.u32.totalorder %s5544_s4, %s5540_s28  ;;  %p5548_p13 = scmp.lt.u32.totalorder %s5540_s28, %s6708_s18 }
 0x219   : > { %p5542_p7 = pnand %p5541_p6, %p5702_p4 }
 0x21a   : > { %p5547_p12 = por %p5546_p11, %p5545_p10 }
 0x21b   : > { %p5543_p9 = pneg %p5542_p7 }
 0x21c   : > { %p5549_p0 = por %p5548_p13, %p5547_p12 }
 0x21e   : > { %p5550_p1 = pnand %p5549_p0, %p5543_p9 }
 0x220   : > { %5553 = shalt.err (!%p5550_p1)
}
 0x221   : > { %s5639_s8 = smov 128   ;;  %s5640_s10 = smov 8   ;;  %v3753_v26 = vmul.f32 %v5237_v33, %v5237_v33  ;;  %v3715_v27 = vadd.f32 %v5237_v33, %v3714_v14  ;;  %v3783_v29 = vadd.f32 %v3782_v23, %v3752_v18 }
 0x222   : > { %5464 = dma.vmem_to_hbm [thread:$0]  (%p5702_p4), %s6710_s9, 4096, %s6708_s18, %s3794_s19, %s5639_s8, %s5639_s8, %s5640_s10  }
 0x223   : > { %v3716_v30 = vrot.slane %v3715_v27, 4  ;;  %v3784_v31 = vadd.f32 %v3783_v29, %v3753_v26  ;;  %s3951_s11 = sshll.u32 %s6658_s5, 1  ;;  %s4454_s21 = sshll.u32 %s5628_s15, 5 }
 0x224   : > { %s190_s23 = scalar_lea.vmem [#allocation4], %s3951_s11  ;;  %s6743_s19 = scalar_lea.hbm %s6794_s3, %s4454_s21 }
 0x225   : > { %v3717_v32 = vadd.f32 %v3716_v30, %v3715_v27  ;;  %v3785_v34 = vrot.slane %v3784_v31, 4  ;;  %s3832_s26 = sshll.u32 %s190_s23, 4  ;;  %s3799_s27 = scalar_lea.sflag [#allocation5], %s6658_s5  ;;  %s6745_s26 = int_to_ptr.vmem [resolvable:$true] %s3832_s26 }
 0x226   : > { %s5554_s28 = scalar_lea.vmem %s6745_s26, 32  ;;  %s5641_s15 = smov [#allocation4]  }
 0x227   : > { %v3718_v35 = vrot.slane %v3717_v32, 2  ;;  %v3786_v36 = vadd.f32 %v3785_v34, %v3784_v31  ;;  %p5555_p2 = scmp.ne.s32.totalorder %s6745_s26, %s5554_s28  ;;  %s5558_s29 = sshll.u32 %s5641_s15, 4  ;;  %s5559_s29 = int_to_ptr.vmem [resolvable:$false] %s5558_s29 }
 0x228   : > { %s5560_s30 = scalar_lea.vmem %s5559_s29, 64  ;;  %p5561_p6 = scmp.lt.s32.totalorder %s6745_s26, %s5559_s29 }
 0x229   : > { %v3719_v38 = vadd.f32 %v3718_v35, %v3717_v32  ;;  %v3787_v39 = vrot.slane %v3786_v36, 2  ;;  %p5556_p3 = pnand %p5555_p2, %p5702_p4  ;;  %p5562_p7 = scmp.lt.s32.totalorder %s5560_s30, %s5554_s28 }
 0x22b   : > { %v3720_v40 = vrot.slane %v3719_v38, 1  ;;  %v3788_v41 = vadd.f32 %v3787_v39, %v3786_v36  ;;  %p5557_p5 = pneg %p5556_p3  ;;  %p5563_p9 = por %p5562_p7, %p5561_p6 }
 0x22d   : > { %v3721_v42 = vadd.f32 %v3720_v40, %v3719_v38  ;;  %v3789_v43 = vrot.slane %v3788_v41, 1  ;;  %p5564_p10 = pnand %p5563_p9, %p5557_p5 }
 0x22f   : > { %v3790_v44 = vadd.f32 %v3789_v43, %v3788_v41  ;;  %3791 = vst [vmem:[%s190_s23] sm:$0x1] %v3721_v42 }
 0x231   : > { %3792 = vst [vmem:[%s190_s23 + $0x1] sm:$0x1] %v3790_v44 }
 0x232   : > { %5567 = shalt.err (!%p5564_p10)
}
 0x233   : > { %s5568_s5 = scalar_lea.hbm %s6743_s19, 32  ;;  %s5572_s7 = scalar_lea.hbm %s6794_s3, 64 }
 0x234   : > { %p5569_p11 = scmp.ne.s32.totalorder %s6743_s19, %s5568_s5  ;;  %p5573_p0 = scmp.lt.u32.totalorder %s6743_s19, %s6794_s3 }
 0x235   : > { %p5574_p1 = scmp.lt.u32.totalorder %s5572_s7, %s5568_s5  ;;  %p5576_p3 = scmp.lt.u32.totalorder %s5568_s5, %s6743_s19 }
 0x236   : > { %p5570_p12 = pnand %p5569_p11, %p5702_p4 }
 0x237   : > { %p5575_p2 = por %p5574_p1, %p5573_p0 }
 0x238   : > { %p5571_p13 = pneg %p5570_p12 }
 0x239   : > { %p5577_p5 = por %p5576_p3, %p5575_p2 }
 0x23b   : > { %p5578_p6 = pnand %p5577_p5, %p5571_p13 }
 0x23d   : > { %5581 = shalt.err (!%p5578_p6)
}
 0x23e   : > { %5465 = dma.vmem_to_hbm [thread:$0]  (%p5702_p4), %s6745_s26, 32, %s6743_s19, %s3799_s27  }
 0x23f PF: > { %p5475_p7 = scmp.ge.s32.totalorder %s5636_s17, 2  ;;  %s3844_s11 = sand.u32 1, %s5616_s12  }
 0x240   : > { %s3845_s21 = scalar_lea.sflag [#allocation3], %s3844_s11 }
 0x241   : > { %p5469_p9 = pnand %p5475_p7, %p5709_p8 }
 0x243   : > { %5607 = dma.done.wait (!%p5469_p9), %s3845_s21, 4096  }
 0x244   : > { %5609 = vsyncadd (!%p5469_p9), %s3845_s21, 4294963200  ;;  %s3854_s23 = scalar_lea.sflag [#allocation5], %s3844_s11 }
 0x245   : > { %5611 = dma.done.wait (!%p5469_p9), %s3854_s23, 32  }
 0x246   : > { %5613 = vsyncadd (!%p5469_p9), %s3854_s23, 4294967264  ;;  %s20_s17 = sadd.s32 1, %s5636_s17   ;;  %s6906_s12 = smov %s5620_s13 }
 0x247   : > { %p17_p10 = scmp.ge.s32.totalorder %s20_s17, 4   ;;  %s6907_s13 = smov %s5624_s14 }
 0x248   : > { %s6908_s14 = smov %s5715_s25  ;;  %s6909_s15 = smov %s5632_s16 }
 0x249   : > { %s6910_s16 = smov %s6912_s20  ;;  %19 = sbr.rel (!%p17_p10) target bundleno = 6 (0x6), region = 91 }
 0x250   :  { %3859 = vsyncpa [#allocation3], 1 }
 0x251   :  { %3861 = vsyncpa [#allocation3 + $0x1], 1 }
 0x252   :  { %3862 = vsyncpa [#allocation5], 1 }
 0x253   :  { %3864 = vsyncpa [#allocation5 + $0x1], 1 }

</bundles_post_ra>
